<compile_context>
chip_gen: v6e
topology: v6e:2x2x1
jax: 0.10.0
libtpu: 0.0.40
codegen_flags: <defaults>
</compile_context>

<pallas_src>
import functools

import jax
import jax.numpy as jnp
from jax.experimental import pallas as pl
from jax.experimental.pallas import tpu as pltpu


_GELU_C0 = 0.7978845608028654            # sqrt(2/pi)
_GELU_C1 = _GELU_C0 * 0.044715           # sqrt(2/pi) * 0.044715


def _round_up(x, m):
    return ((x + m - 1) // m) * m


def _tanh_gelu(h):
    # Matches torch.nn.functional.gelu(x, approximate='tanh').
    h2 = h * h
    return 0.5 * h * (1.0 + jnp.tanh(h * (_GELU_C0 + _GELU_C1 * h2)))


def _mlp_resident_kernel(x_ref, w1_ref, b1_ref, w2_ref, b2_ref, o_ref):
    # x_ref: (tm, H) input dtype.  w1_ref: (H, Ip) bf16 (resident).
    # b1_ref: (1, Ip) f32.  w2_ref: (Ip, H) bf16 (resident).  b2_ref: (1, H) f32.
    x = x_ref[...].astype(w1_ref.dtype)                       # cast in-kernel
    h = jnp.dot(x, w1_ref[...], preferred_element_type=jnp.float32) + b1_ref[...]
    g = _tanh_gelu(h)
    y = jnp.dot(g.astype(w2_ref.dtype), w2_ref[...],
                preferred_element_type=jnp.float32)
    o_ref[...] = (y + b2_ref[...]).astype(o_ref.dtype)


def _mlp_ktiled_kernel(x_ref, w1_ref, b1_ref, w2_ref, b2_ref, o_ref, acc_ref):
    # Grid (row_tiles, k_tiles); k innermost ("arbitrary").  Weight slabs
    # (H, tI)/(tI, H) are streamed; fc2 accumulates into f32 (tm, H) scratch.
    k = pl.program_id(1)

    @pl.when(k == 0)
    def _():
        acc_ref[...] = jnp.zeros_like(acc_ref)

    x = x_ref[...].astype(w1_ref.dtype)
    h = jnp.dot(x, w1_ref[...], preferred_element_type=jnp.float32) + b1_ref[...]
    g = _tanh_gelu(h)
    acc_ref[...] += jnp.dot(g.astype(w2_ref.dtype), w2_ref[...],
                            preferred_element_type=jnp.float32)

    @pl.when(k == pl.num_programs(1) - 1)
    def _():
        o_ref[...] = (acc_ref[...] + b2_ref[...]).astype(o_ref.dtype)


def _vmem_capacity_bytes():
    try:
        return int(pltpu.get_tpu_info().vmem_capacity_bytes)
    except Exception:
        return 64 << 20   # conservative (v7x-sized) fallback


def prepare_siglip_mlp_params(w1, b1, w2, b2, compute_dtype=jnp.bfloat16):
    """One-time weight preparation.  Call ONCE (not per forward).

    w1: [H, I] (fc1.weight.T), b1: [I], w2: [I, H] (fc2.weight.T), b2: [H].
    Casts weights to the MXU compute dtype and zero-pads the intermediate dim
    to a multiple of 128 lanes (padded columns contribute exactly zero).
    """
    H, I = w1.shape
    Ip = _round_up(I, 128)
    if Ip != I:
        w1 = jnp.pad(w1, ((0, 0), (0, Ip - I)))
        b1 = jnp.pad(b1, ((0, Ip - I),))
        w2 = jnp.pad(w2, ((0, Ip - I), (0, 0)))
    return (w1.astype(compute_dtype),
            b1.reshape(1, Ip).astype(jnp.float32),
            w2.astype(compute_dtype),
            b2.reshape(1, H).astype(jnp.float32))


@functools.partial(jax.jit, static_argnames=("row_tile", "k_tile", "force_k_tiling"))
def siglip_mlp(hidden_states, w1, b1, w2, b2, *, row_tile=None, k_tile=None,
               force_k_tiling=False):
    """SiglipMLP forward.  hidden_states: [B, S, H].

    w1/b1/w2/b2 should come from prepare_siglip_mlp_params() (already bf16 and
    lane-padded); the wrapper performs no per-call weight casts or copies.
    """
    B, S, H = hidden_states.shape
    Hw, Ip = w1.shape
    assert Hw == H and w2.shape == (Ip, H), "weight shapes must be [H,Ip]/[Ip,H]"
    M = B * S
    out_dtype = hidden_states.dtype
    x_item = jnp.dtype(hidden_states.dtype).itemsize
    w_item = jnp.dtype(w1.dtype).itemsize
    o_item = jnp.dtype(out_dtype).itemsize

    if b1.ndim == 1:
        b1 = b1.reshape(1, Ip)
    if b2.ndim == 1:
        b2 = b2.reshape(1, H)
    b1 = b1.astype(jnp.float32)
    b2 = b2.astype(jnp.float32)

    # Generation-aware VMEM budget (never above physical capacity).
    vmem_cap = _vmem_capacity_bytes()
    vmem_budget = vmem_cap - (8 << 20)

    if row_tile is None:
        # 512 rows on 128 MiB VMEM parts (v5e/v6e), 256 on v7x (64 MiB).
        row_tile = 512 if vmem_cap >= (96 << 20) else 256

    # Row tiling: hug M (round to 16 for bf16 sublane packing) and keep >= 2
    # grid steps when possible so the "parallel" axis spans both TCs on v7x.
    min_tiles = 2 if M >= 64 else 1
    num_row_tiles = max(pl.cdiv(M, row_tile), min_tiles)
    tm = _round_up(pl.cdiv(M, num_row_tiles), 16)
    M_pad = tm * num_row_tiles

    x2d = hidden_states.reshape(M, H)
    if M_pad != M:
        # TODO(synk): fold this ragged-M pad into the input DMA
        # (CompilerParams(allow_input_fusion=...)) instead of materializing.
        x2d = jnp.pad(x2d, ((0, M_pad - M), (0, 0)))

    # Resident plan estimate: single-buffered weights + double-buffered x/out
    # tiles + f32 (tm, Ip) GELU intermediates.
    w_bytes = 2 * H * Ip * w_item + (Ip + H) * 4
    tile_bytes = 2 * tm * H * (x_item + o_item)
    interm_bytes = 3 * tm * Ip * 4
    resident_est = w_bytes + tile_bytes + interm_bytes
    use_ktiled = force_k_tiling or (resident_est > vmem_budget)

    cost = pl.CostEstimate(
        flops=4 * M_pad * H * Ip,            # two matmuls
        transcendentals=M_pad * Ip,          # tanh
        bytes_accessed=int(M_pad * H * (x_item + o_item) + w_bytes),
    )

    if not use_ktiled:
        vmem_limit = int(1.15 * resident_est) + (2 << 20)
        vmem_limit = max(min(vmem_limit, vmem_budget), min(32 << 20, vmem_budget))
        resident = dict(pipeline_mode=pl.Buffered(1))   # constant index -> 1 buffer
        out2d = pl.pallas_call(
            _mlp_resident_kernel,
            out_shape=jax.ShapeDtypeStruct((M_pad, H), out_dtype),
            grid_spec=pltpu.PrefetchScalarGridSpec(
                num_scalar_prefetch=0,
                grid=(num_row_tiles,),
                in_specs=[
                    pl.BlockSpec((tm, H), lambda i: (i, 0)),               # x rows
                    pl.BlockSpec((H, Ip), lambda i: (0, 0), **resident),   # w1
                    pl.BlockSpec((1, Ip), lambda i: (0, 0), **resident),   # b1
                    pl.BlockSpec((Ip, H), lambda i: (0, 0), **resident),   # w2
                    pl.BlockSpec((1, H), lambda i: (0, 0), **resident),    # b2
                ],
                out_specs=pl.BlockSpec((tm, H), lambda i: (i, 0)),
            ),
            compiler_params=pltpu.CompilerParams(
                dimension_semantics=("parallel",),
                vmem_limit_bytes=vmem_limit,
            ),
            cost_estimate=cost,
        )(x2d, w1, b1, w2, b2)
    else:
        # VMEM-constrained fallback: stream weight slabs over the intermediate
        # dim, accumulate fc2 into an f32 scratch (init/finalize via pl.when).
        if k_tile is None:
            k_tile = 128
            for cand in (1024, 512, 256, 128):
                if Ip % cand == 0:
                    k_tile = cand
                    break
        assert Ip % k_tile == 0, "k_tile must divide the (padded) intermediate dim"
        nk = Ip // k_tile
        slab_bytes = 2 * (2 * H * k_tile * w_item + k_tile * 4) + H * 4
        ktiled_est = slab_bytes + tile_bytes + tm * H * 4 + 3 * tm * k_tile * 4
        vmem_limit = int(1.15 * ktiled_est) + (2 << 20)
        vmem_limit = max(min(vmem_limit, vmem_budget), min(32 << 20, vmem_budget))
        out2d = pl.pallas_call(
            _mlp_ktiled_kernel,
            out_shape=jax.ShapeDtypeStruct((M_pad, H), out_dtype),
            grid_spec=pltpu.PrefetchScalarGridSpec(
                num_scalar_prefetch=0,
                grid=(num_row_tiles, nk),
                in_specs=[
                    pl.BlockSpec((tm, H), lambda i, k: (i, 0)),       # x rows
                    pl.BlockSpec((H, k_tile), lambda i, k: (0, k)),   # w1 slab
                    pl.BlockSpec((1, k_tile), lambda i, k: (0, k)),   # b1 slab
                    pl.BlockSpec((k_tile, H), lambda i, k: (k, 0)),   # w2 slab
                    pl.BlockSpec((1, H), lambda i, k: (0, 0),
                                 pipeline_mode=pl.Buffered(1)),       # b2
                ],
                out_specs=pl.BlockSpec((tm, H), lambda i, k: (i, 0)),
                scratch_shapes=[pltpu.VMEM((tm, H), jnp.float32)],
            ),
            compiler_params=pltpu.CompilerParams(
                dimension_semantics=("parallel", "arbitrary"),
                vmem_limit_bytes=vmem_limit,
            ),
            cost_estimate=cost,
        )(x2d, w1, b1, w2, b2)

    if M_pad != M:
        out2d = out2d[:M]
    return out2d.reshape(B, S, H)


def _reference_mlp(x, w1, b1, w2, b2):
    h = x @ w1 + b1
    g = jax.nn.gelu(h, approximate=True)
    return g @ w2 + b2


if __name__ == "__main__":
    key = jax.random.PRNGKey(0)

    def make_case(B, S, H, I, seed_key):
        kx, k1, k2, k3, k4 = jax.random.split(seed_key, 5)
        x = jax.random.normal(kx, (B, S, H), dtype=jnp.float32)
        w1 = jax.random.normal(k1, (H, I), dtype=jnp.float32) * 0.02
        b1 = jax.random.normal(k2, (I,), dtype=jnp.float32) * 0.02
        w2 = jax.random.normal(k3, (I, H), dtype=jnp.float32) * 0.02
        b2 = jax.random.normal(k4, (H,), dtype=jnp.float32) * 0.02
        return x, w1, b1, w2, b2

    def check(out, x, w1, b1, w2, b2, name):
        ref = _reference_mlp(x, w1, b1, w2, b2)
        assert out.shape == x.shape, f"bad output shape ({name})"
        assert jnp.allclose(out, ref, atol=2e-2, rtol=5e-2), \
            f"mismatch vs reference ({name})"

    k_a, k_b, k_c = jax.random.split(key, 3)

    # Case A: lane-aligned dims, resident-weights plan (single-buffered weights).
    x, w1, b1, w2, b2 = make_case(B=2, S=128, H=128, I=512, seed_key=k_a)
    params = prepare_siglip_mlp_params(w1, b1, w2, b2)      # one-time bf16 prep
    out = jax.block_until_ready(siglip_mlp(x, *params))
    check(out, x, w1, b1, w2, b2, "resident")

    # Case B: ragged rows (M=18) and non-128-multiple intermediate (I=192,
    # zero-padded once to 256 inside prepare_siglip_mlp_params).
    x, w1, b1, w2, b2 = make_case(B=2, S=9, H=128, I=192, seed_key=k_b)
    params = prepare_siglip_mlp_params(w1, b1, w2, b2)
    out = jax.block_until_ready(siglip_mlp(x, *params))
    check(out, x, w1, b1, w2, b2, "ragged")

    # Case C: force the I-tiled accumulator fallback (v7x VMEM-constrained path).
    x, w1, b1, w2, b2 = make_case(B=2, S=64, H=256, I=512, seed_key=k_c)
    params = prepare_siglip_mlp_params(w1, b1, w2, b2)
    out = jax.block_until_ready(
        siglip_mlp(x, *params, force_k_tiling=True, k_tile=128))
    check(out, x, w1, b1, w2, b2, "k-tiled")

    print("KERNEL_OK")
</pallas_src>

<mosaic_0001>
module attributes {stable_mosaic.version = 11 : i64} {
  func.func @_mlp_resident_kernel(%arg0: i32, %arg1: memref<128x128xf32, #tpu.memory_space<vmem>>, %arg2: memref<128x512xbf16, #tpu.memory_space<vmem>>, %arg3: memref<1x512xf32, #tpu.memory_space<vmem>>, %arg4: memref<512x128xbf16, #tpu.memory_space<vmem>>, %arg5: memref<1x128xf32, #tpu.memory_space<vmem>>, %arg6: memref<128x128xf32, #tpu.memory_space<vmem>>) attributes {dimension_semantics = [#tpu.dimension_semantics<parallel>], iteration_bounds = array<i64: 2>, scalar_prefetch = 0 : i64, scratch_operands = 0 : i64, tpu.core_type = #tpu.core_type<tc>, window_params = [{transform_indices = @transform_0, window_bounds = array<i64: 128, 128>}, {pipeline_mode = #tpu.pipeline_mode<synchronous>, transform_indices = @transform_1, window_bounds = array<i64: 128, 512>}, {pipeline_mode = #tpu.pipeline_mode<synchronous>, transform_indices = @transform_2, window_bounds = array<i64: 1, 512>}, {pipeline_mode = #tpu.pipeline_mode<synchronous>, transform_indices = @transform_3, window_bounds = array<i64: 512, 128>}, {pipeline_mode = #tpu.pipeline_mode<synchronous>, transform_indices = @transform_4, window_bounds = array<i64: 1, 128>}, {transform_indices = @transform_5, window_bounds = array<i64: 128, 128>}]} {
    %c0 = arith.constant 0 : index
    %c0_0 = arith.constant 0 : index
    %0 = vector.load %arg1[%c0, %c0_0] : memref<128x128xf32, #tpu.memory_space<vmem>>, vector<128x128xf32>
    %1 = arith.truncf %0 : vector<128x128xf32> to vector<128x128xbf16>
    %c0_1 = arith.constant 0 : index
    %c0_2 = arith.constant 0 : index
    %2 = vector.load %arg2[%c0_1, %c0_2] : memref<128x512xbf16, #tpu.memory_space<vmem>>, vector<128x512xbf16>
    %cst = arith.constant dense<0.000000e+00> : vector<128x512xf32>
    %3 = tpu.matmul %1, %2, %cst {dimension_numbers = #tpu.dot_dimension_numbers<[1], [0], [0], [1], [0, 0, 1, 1], [], []>} : vector<128x128xbf16>, vector<128x512xbf16>, vector<128x512xf32> -> vector<128x512xf32>
    %c0_3 = arith.constant 0 : index
    %c0_4 = arith.constant 0 : index
    %4 = vector.load %arg3[%c0_3, %c0_4] : memref<1x512xf32, #tpu.memory_space<vmem>>, vector<1x512xf32>
    %5 = vector.broadcast %4 : vector<1x512xf32> to vector<128x512xf32>
    %6 = arith.addf %3, %5 : vector<128x512xf32>
    %7 = arith.mulf %6, %6 : vector<128x512xf32>
    %cst_5 = arith.constant 5.000000e-01 : f32
    %8 = vector.broadcast %cst_5 : f32 to vector<128x512xf32>
    %9 = arith.mulf %8, %6 : vector<128x512xf32>
    %cst_6 = arith.constant 0.0356774069 : f32
    %10 = vector.broadcast %cst_6 : f32 to vector<128x512xf32>
    %11 = arith.mulf %10, %7 : vector<128x512xf32>
    %cst_7 = arith.constant 0.797884583 : f32
    %12 = vector.broadcast %cst_7 : f32 to vector<128x512xf32>
    %13 = arith.addf %12, %11 : vector<128x512xf32>
    %14 = arith.mulf %6, %13 : vector<128x512xf32>
    %15 = math.tanh %14 : vector<128x512xf32>
    %cst_8 = arith.constant 1.000000e+00 : f32
    %16 = vector.broadcast %cst_8 : f32 to vector<128x512xf32>
    %17 = arith.addf %16, %15 : vector<128x512xf32>
    %18 = arith.mulf %9, %17 : vector<128x512xf32>
    %19 = arith.truncf %18 : vector<128x512xf32> to vector<128x512xbf16>
    %c0_9 = arith.constant 0 : index
    %c0_10 = arith.constant 0 : index
    %20 = vector.load %arg4[%c0_9, %c0_10] : memref<512x128xbf16, #tpu.memory_space<vmem>>, vector<512x128xbf16>
    %cst_11 = arith.constant dense<0.000000e+00> : vector<128x128xf32>
    %21 = tpu.matmul %19, %20, %cst_11 {dimension_numbers = #tpu.dot_dimension_numbers<[1], [0], [0], [1], [0, 0, 1, 1], [], []>} : vector<128x512xbf16>, vector<512x128xbf16>, vector<128x128xf32> -> vector<128x128xf32>
    %c0_12 = arith.constant 0 : index
    %c0_13 = arith.constant 0 : index
    %22 = vector.load %arg5[%c0_12, %c0_13] : memref<1x128xf32, #tpu.memory_space<vmem>>, vector<1x128xf32>
    %23 = vector.broadcast %22 : vector<1x128xf32> to vector<128x128xf32>
    %24 = arith.addf %21, %23 : vector<128x128xf32>
    %c0_14 = arith.constant 0 : index
    %c0_15 = arith.constant 0 : index
    %25 = vector.load %arg6[%c0_14, %c0_15] : memref<128x128xf32, #tpu.memory_space<vmem>>, vector<128x128xf32>
    tpu.vector_store %arg6[%c0_14, %c0_15], %24 {strides = array<i32>} : memref<128x128xf32, #tpu.memory_space<vmem>>, vector<128x128xf32>,
    return
  }
  func.func @transform_0(%arg0: i32) -> (i32, i32) {
    %c0_i32 = arith.constant 0 : i32
    %c0_i32_0 = arith.constant 0 : i32
    return %arg0, %c0_i32 : i32, i32
  }
  func.func @transform_1(%arg0: i32) -> (i32, i32) {
    %c0_i32 = arith.constant 0 : i32
    %c0_i32_0 = arith.constant 0 : i32
    %c0_i32_1 = arith.constant 0 : i32
    return %c0_i32, %c0_i32_0 : i32, i32
  }
  func.func @transform_2(%arg0: i32) -> (i32, i32) {
    %c0_i32 = arith.constant 0 : i32
    %c0_i32_0 = arith.constant 0 : i32
    %c0_i32_1 = arith.constant 0 : i32
    return %c0_i32, %c0_i32_0 : i32, i32
  }
  func.func @transform_3(%arg0: i32) -> (i32, i32) {
    %c0_i32 = arith.constant 0 : i32
    %c0_i32_0 = arith.constant 0 : i32
    %c0_i32_1 = arith.constant 0 : i32
    return %c0_i32, %c0_i32_0 : i32, i32
  }
  func.func @transform_4(%arg0: i32) -> (i32, i32) {
    %c0_i32 = arith.constant 0 : i32
    %c0_i32_0 = arith.constant 0 : i32
    %c0_i32_1 = arith.constant 0 : i32
    return %c0_i32, %c0_i32_0 : i32, i32
  }
  func.func @transform_5(%arg0: i32) -> (i32, i32) {
    %c0_i32 = arith.constant 0 : i32
    %c0_i32_0 = arith.constant 0 : i32
    return %arg0, %c0_i32 : i32, i32
  }
}

</mosaic_0001>

<bundles_post_ra>
// kernel: siglip_mlp.1
= control target key start
LH: loop header
LB: loop body
LE: loop exit
PB: predicated region body
PF: predicated region fallthrough
CT: control target
= control target key end

     0   :  { %10 = vsyncpa [#allocation3], 0  ;;  %s3544_s0 = inlined_call_operand.hbm [shape: f32[256,128], index: 0, kind: input, shape index: {}]   ;;  %s3545_s1 = inlined_call_operand.hbm [shape: bf16[128,512], index: 1, kind: input, shape index: {}]   ;;  %s3546_s2 = inlined_call_operand.vmem [shape: f32[1,512], index: 2, kind: input, shape index: {}]   ;;  %s3547_s3 = inlined_call_operand.hbm [shape: bf16[512,128], index: 3, kind: input, shape index: {}]   ;;  %s3548_s4 = inlined_call_operand.vmem [shape: f32[1,128], index: 4, kind: input, shape index: {}]   ;;  %s3549_s5 = inlined_call_operand.hbm [shape: f32[256,128], index: 5, kind: output, shape index: {}]  }
   0x1   :  { %12 = vsyncpa [#allocation3 + $0x1], 0 }
   0x2   :  { %13 = vsyncpa [#allocation6], 0 }
   0x3   :  { %14 = vsyncpa [#allocation4], 0 }
   0x4   :  { %16 = vsyncpa [#allocation4 + $0x1], 0  ;;  %s2552_s18 = smov 0   ;;  %s2554_s19 = smov 0  }
   0x5   :  { %s2556_s20 = smov 0   ;;  %s2558_s21 = smov 0  }
   0x6 LB: > { %s2573_s22 = sadd.s32 4294967295, %s2507_s21   ;;  %s1862_s23 = sadd.s32 4294967294, %s2507_s21   ;;  %s2507_s21 = sphi %s2558_s21, %s3656_s21   ;;  %s2503_s20 = sphi %s2556_s20, %s3655_s20   ;;  %s2499_s19 = sphi %s2554_s19, %s3654_s19   ;;  %s2495_s18 = sphi %s2552_s18, %s3653_s18  }
   0x7   : > { %p42_p0 = scmp.ne.s32.totalorder %s2499_s19, %s2495_s18  ;;  %p3550_p1 = scmp.eq.s32.totalorder %s2573_s22, 0 }
   0x8   : > { %p156_p3 = scmp.eq.s32.totalorder %s1862_s23, 1  ;;  %p1863_p5 = scmp.ge.s32.totalorder %s2507_s21, 1 }
   0x9   : > { %p2582_p4 = por %p3550_p1, %p42_p0  ;;  %p163_p7 = scmp.lt.s32.totalorder %s2507_s21, 3 }
   0xa   : > { %p2587_p6 = por %p156_p3, %p42_p0  ;;  %s2509_s27 = smov [#allocation5]  }
   0xb   : > { %s3561_s24 = scalar_select %p2582_p4, 1, 0 }
   0xc   : > { %s3562_s25 = scalar_select %p2587_p6, 1, 0 }
   0xd   : > { %p2592_p8 = pnand %p1863_p5, %p163_p7  ;;  %s175_s28 = sshll.u32 %s2509_s27, 4  ;;  %s176_s28 = int_to_ptr.vmem [resolvable:$true] %s175_s28 }
   0xe   : > { %s2510_s30 = smov [#allocation7]   ;;  %s2370_s7 = scalar_lea.vmem %s176_s28, 4096 }
   0xf   : > { %s3563_s26 = scalar_select %p2592_p8, 1, 0 }
  0x10   : > { %p2087_p9 = pneg %p2592_p8  ;;  %s191_s6 = sshll.u32 %s2510_s30, 4  ;;  %s192_s6 = int_to_ptr.vmem [resolvable:$true] %s191_s6 }
  0x11   : > { %p2371_p13 = scmp.ne.s32.totalorder %s176_s28, %s2370_s7  ;;  %p2378_p5 = scmp.lt.s32.totalorder %s176_s28, %s176_s28 }
  0x12   : > { %p2601_p11 = pnand %p2087_p9, %p3550_p1  ;;  %p2379_p7 = scmp.lt.s32.totalorder %s2370_s7, %s2370_s7 }
  0x14   : > { %p2361_p12 = pneg %p2601_p11  ;;  %p2380_p10 = por %p2379_p7, %p2378_p5 }
  0x16   : > { %p2373_p0 = pnand %p2371_p13, %p2361_p12 }
  0x18   : > { %p2374_p3 = pneg %p2373_p0 }
  0x1a   : > { %p2381_p9 = pnand %p2380_p10, %p2374_p3 }
  0x1c   : > { %2384 = shalt.err (!%p2381_p9)
}
  0x1d   : > { %s2511_s8 = smov 256   ;;  %s2512_s9 = smov 16  }
  0x1e   : > { %2090 = dma.hbm_to_vmem [thread:$0]  (!%p2601_p11), %s3545_s1, 4096, %s176_s28, [#allocation6], %s2511_s8, %s2511_s8, %s2512_s9  }
  0x1f   : > { %s2396_s12 = scalar_lea.vmem %s192_s6, 4096  ;;  %p2404_p2 = scmp.lt.s32.totalorder %s192_s6, %s192_s6 }
  0x20   : > { %p2397_p1 = scmp.ne.s32.totalorder %s192_s6, %s2396_s12  ;;  %p2405_p6 = scmp.lt.s32.totalorder %s2396_s12, %s2396_s12 }
  0x22   : > { %p2399_p13 = pnand %p2397_p1, %p2361_p12  ;;  %p2406_p5 = por %p2405_p6, %p2404_p2 }
  0x24   : > { %p2400_p0 = pneg %p2399_p13 }
  0x26   : > { %p2407_p10 = pnand %p2406_p5, %p2400_p0 }
  0x28   : > { %2410 = shalt.err (!%p2407_p10)
}
  0x29   : > { %s2513_s13 = smov 64   ;;  %s2514_s14 = smov 4  }
  0x2a   : > { %2093 = dma.hbm_to_vmem [thread:$0]  (!%p2601_p11), %s3547_s3, 4096, %s192_s6, [#allocation6], %s2513_s13, %s2513_s13, %s2514_s14  }
  0x2b   : > { %s2624_s17 = sadd.s32 1, %s2507_s21   ;;  %s29_s27 = sadd.s32 1, %s2503_s20 }
  0x2c   : > { %s26_s23 = ssub.s32 %s2507_s21, %s2624_s17  ;;  %p36_p2 = scmp.ne.s32.totalorder %s2503_s20, %s2499_s19 }
  0x2d   : > { %p27_p1 = scmp.eq.s32.totalorder %s26_s23, 0  ;;  %p37_p6 = scmp.eq.s32.totalorder %s2507_s21, 0 }
  0x2e   : > { %p3565_p3 = scmp.eq.s32.totalorder %s2573_s22, 1  ;;  %p2104_p9 = scmp.lt.s32.totalorder %s2507_s21, 2 }
  0x2f   : > { %s2633_s28 = scalar_select %p27_p1, %s2503_s20, %s29_s27  }
  0x30   : > { %p38_p12 = por %p37_p6, %p36_p2  ;;  %p2637_p7 = por %p3565_p3, %p36_p2 }
  0x31   : > { %s208_s29 = sand.u32 1, %s2503_s20   ;;  %s1945_s6 = sshll.u32 %s2507_s21, 11 }
  0x32   : > { %s3566_s30 = scalar_select %p2637_p7, 1, 0 }
  0x33   : > { %s1867_s7 = sshll.u32 %s208_s29, 7  ;;  %s2647_s10 = scalar_lea.hbm %s3544_s0, %s1945_s6 }
  0x34   : > { %s212_s11 = scalar_lea.vmem [#allocation2], %s1867_s7  ;;  %p2651_p11 = pnand %p2104_p9, %p38_p12 }
  0x35   : > { %s219_s12 = sshll.u32 %s212_s11, 4  ;;  %s2655_s14 = scalar_lea.sflag [#allocation3], %s208_s29  ;;  %s2649_s12 = int_to_ptr.vmem [resolvable:$true] %s219_s12 }
  0x36   : > { %s2411_s15 = scalar_lea.hbm %s2647_s10, 2048  ;;  %p2413_p0 = pneg %p2651_p11 }
  0x37   : > { %p2412_p13 = scmp.ne.s32.totalorder %s2647_s10, %s2411_s15  ;;  %s2416_s27 = scalar_lea.hbm %s3544_s0, 4096 }
  0x38   : > { %p2417_p1 = scmp.lt.s32.totalorder %s2647_s10, %s3544_s0  ;;  %p2418_p2 = scmp.lt.s32.totalorder %s2416_s27, %s2411_s15 }
  0x39   : > { %p2414_p5 = pnand %p2413_p0, %p2412_p13 }
  0x3a   : > { %p2419_p6 = por %p2418_p2, %p2417_p1 }
  0x3b   : > { %p2415_p10 = pneg %p2414_p5 }
  0x3d   : > { %p2420_p12 = pnand %p2419_p6, %p2415_p10 }
  0x3f   : > { %2423 = shalt.err (!%p2420_p12)
}
  0x40   : > { %s2424_s29 = scalar_lea.vmem %s2649_s12, 2048  ;;  %s2515_s8 = smov [#allocation2]  }
  0x41   : > { %p2425_p3 = scmp.ne.s32.totalorder %s2649_s12, %s2424_s29  ;;  %s2429_s9 = sshll.u32 %s2515_s8, 4  ;;  %s2430_s9 = int_to_ptr.vmem [resolvable:$false] %s2429_s9 }
  0x42   : > { %s2431_s11 = scalar_lea.vmem %s2430_s9, 4096  ;;  %p2432_p5 = scmp.lt.s32.totalorder %s2649_s12, %s2430_s9 }
  0x43   : > { %p2427_p9 = pnand %p2425_p3, %p2413_p0  ;;  %p2433_p7 = scmp.lt.s32.totalorder %s2431_s11, %s2424_s29 }
  0x45   : > { %p2428_p13 = pneg %p2427_p9  ;;  %p2434_p4 = por %p2433_p7, %p2432_p5 }
  0x47   : > { %p2435_p8 = pnand %p2434_p4, %p2428_p13 }
  0x49   : > { %2438 = shalt.err (!%p2435_p8)
}
  0x4a   : > { %s2516_s15 = smov 128   ;;  %s2517_s16 = smov 8  }
  0x4b   : > { %2097 = dma.hbm_to_vmem [thread:$0]  (!%p2651_p11), %s2647_s10, 2048, %s2649_s12, %s2655_s14, %s2516_s15, %s2516_s15, %s2517_s16  }
  0x4c   : > { %p3568_p0 = scmp.ne.s32.totalorder %s3563_s26, 0 }
  0x4e   : > { %231 = sbr.rel (%p3568_p0) target bundleno = 699 (0x2bb), region = 40 }
  0x53   : > { %s2679_s23 = sand.u32 1, %s2499_s19   ;;  %p3569_p4 = scmp.ne.s32.totalorder %s3561_s24, 0 }
  0x54   : > { %s1871_s27 = sshll.u32 %s2679_s23, 7  ;;  %s234_s7 = scalar_lea.sflag [#allocation3], %s2679_s23 }
  0x55   : > { %s2685_s6 = scalar_lea.vmem [#allocation2], %s1871_s27 }
  0x56   : > { %2482 = dma.done.wait (%p3569_p4), %s234_s7, 2048  }
  0x57   : > { %2484 = vsyncadd (%p3569_p4), %s234_s7, 4294965248  ;;  %p3570_p8 = scmp.eq.s32.totalorder %s2573_s22, 0 }
  0x59   : > { %2486 = dma.done.wait (%p3570_p8), [#allocation6], 8192   ;;  %p3571_p7 = pmov %p3570_p8 }
  0x5a   : > { %v2518_v0 = vmov 0   ;;  %v2151_v1 = vld [vmem:[#allocation5 + $0xe4] ss:$16 sps:$4 sm:$0xff]   ;;  %v2153_v2 = vld [vmem:[#allocation5 + $0xec] ss:$16 sps:$4 sm:$0xff]   ;;  %s3461_s13 = scalar_lea.vmem [#allocation8], %s1871_s27 }
  0x5b   : > { %2488 = vsyncadd (%p3571_p7), [#allocation6], 4294959104  ;;  %545 = vmatprep.mubr.bf16.mxu0 %v2518_v0  ;;  %658 = vmatprep.mubr.bf16.mxu1 %v2518_v0  ;;  %v2155_v3 = vld [vmem:[#allocation5 + $0xe0] ss:$16 sps:$4 sm:$0xff]   ;;  %v2156_v4 = vld [vmem:[#allocation5 + $0xe8] ss:$16 sps:$4 sm:$0xff]  }
  0x5c   : > { %513 = vmatprep.subr.bf16.mxu0 %v2151_v1  ;;  %626 = vmatprep.subr.bf16.mxu1 %v2153_v2  ;;  %v2157_v5 = vld [vmem:[#allocation5 + $0xc4] ss:$16 sps:$4 sm:$0xff]   ;;  %v2159_v6 = vld [vmem:[#allocation5 + $0xcc] ss:$16 sps:$4 sm:$0xff]   ;;  %v2161_v7 = vld [vmem:[#allocation5 + $0xc0] ss:$16 sps:$4 sm:$0xff]  }
  0x5d   : > { %514 = vmatpush1.bf16.msra.mxu0 %v2155_v3  ;;  %627 = vmatpush1.bf16.msra.mxu1 %v2156_v4  ;;  %v2162_v8 = vld [vmem:[#allocation5 + $0xc8] ss:$16 sps:$4 sm:$0xff]   ;;  %v2163_v9 = vld [vmem:[#allocation5 + $0xa4] ss:$16 sps:$4 sm:$0xff]   ;;  %v2165_v10 = vld [vmem:[#allocation5 + $0xac] ss:$16 sps:$4 sm:$0xff]  }
  0x5e   : > { %515 = vmatprep.subr.bf16.mxu0 %v2157_v5  ;;  %628 = vmatprep.subr.bf16.mxu1 %v2159_v6  ;;  %v2167_v11 = vld [vmem:[#allocation5 + $0xa0] ss:$16 sps:$4 sm:$0xff]   ;;  %v2168_v12 = vld [vmem:[#allocation5 + $0xa8] ss:$16 sps:$4 sm:$0xff]   ;;  %v2169_v13 = vld [vmem:[#allocation5 + $0x84] ss:$16 sps:$4 sm:$0xff]  }
  0x5f   : > { %v2171_v14 = vld [vmem:[#allocation5 + $0x8c] ss:$16 sps:$4 sm:$0xff]   ;;  %v2173_v15 = vld [vmem:[#allocation5 + $0x80] ss:$16 sps:$4 sm:$0xff]   ;;  %v2174_v16 = vld [vmem:[#allocation5 + $0x88] ss:$16 sps:$4 sm:$0xff]  }
  0x60   : > { %v2175_v17 = vld [vmem:[#allocation5 + $0x64] ss:$16 sps:$4 sm:$0xff]   ;;  %v2177_v18 = vld [vmem:[#allocation5 + $0x6c] ss:$16 sps:$4 sm:$0xff]   ;;  %v2179_v19 = vld [vmem:[#allocation5 + $0x60] ss:$16 sps:$4 sm:$0xff]  }
  0x61   : > { %516 = vmatpush1.bf16.msra.mxu0 %v2161_v7  ;;  %629 = vmatpush1.bf16.msra.mxu1 %v2162_v8  ;;  %v2180_v20 = vld [vmem:[#allocation5 + $0x68] ss:$16 sps:$4 sm:$0xff]   ;;  %v2181_v21 = vld [vmem:[#allocation5 + $0x44] ss:$16 sps:$4 sm:$0xff]   ;;  %v2183_v22 = vld [vmem:[#allocation5 + $0x4c] ss:$16 sps:$4 sm:$0xff]  }
  0x62   : > { %517 = vmatprep.subr.bf16.mxu0 %v2163_v9  ;;  %630 = vmatprep.subr.bf16.mxu1 %v2165_v10  ;;  %v2185_v23 = vld [vmem:[#allocation5 + $0x40] ss:$16 sps:$4 sm:$0xff]   ;;  %v2186_v24 = vld [vmem:[#allocation5 + $0x48] ss:$16 sps:$4 sm:$0xff]   ;;  %v2187_v25 = vld [vmem:[#allocation5 + $0x24] ss:$16 sps:$4 sm:$0xff]  }
  0x63   : > { %v2189_v26 = vld [vmem:[#allocation5 + $0x2c] ss:$16 sps:$4 sm:$0xff]   ;;  %v2191_v27 = vld [vmem:[#allocation5 + $0x20] ss:$16 sps:$4 sm:$0xff]   ;;  %v2192_v28 = vld [vmem:[#allocation5 + $0x28] ss:$16 sps:$4 sm:$0xff]  }
  0x64   : > { %v2193_v29 = vld [vmem:[#allocation5 + $0x4] ss:$16 sps:$4 sm:$0xff]   ;;  %v2195_v30 = vld [vmem:[#allocation5 + $0xc] ss:$16 sps:$4 sm:$0xff]   ;;  %v2197_v31 = vld [vmem:[#allocation5] ss:$16 sps:$4 sm:$0xff]  }
  0x65   : > { %518 = vmatpush1.bf16.msra.mxu0 %v2167_v11  ;;  %631 = vmatpush1.bf16.msra.mxu1 %v2168_v12  ;;  %v2198_v32 = vld [vmem:[#allocation5 + $0x8] ss:$16 sps:$4 sm:$0xff]   ;;  %v275_v33 = vld [vmem:[%s2685_s6] sm:$0xff]  ;;  %v2203_v40 = vld [vmem:[#allocation7 + $0x70] sm:$0xff]   ;;  %s1946_s14 = sshll.u32 %s2573_s22, 11  ;;  %s1770_s29 = sshll.u32 %s3461_s13, 4  ;;  %s3500_s29 = int_to_ptr.vmem [resolvable:$true] %s1770_s29 }
  0x66   : > { %519 = vmatprep.subr.bf16.mxu0 %v2169_v13  ;;  %632 = vmatprep.subr.bf16.mxu1 %v2171_v14  ;;  %v276_v34 = vld [vmem:[%s2685_s6 + $0x8] sm:$0xff]  ;;  %v2199_v35 = vld [vmem:[#allocation7 + $0x78] sm:$0xff]   ;;  %v277_v41 = vld [vmem:[%s2685_s6 + $0x10] sm:$0xff]  ;;  %s3498_s11 = scalar_lea.hbm %s3549_s5, %s1946_s14  ;;  %s1757_s15 = scalar_lea.sflag [#allocation4], %s2679_s23 }
  0x67   : > { %v2201_v36 = vld [vmem:[#allocation7 + $0xf8] sm:$0xff]   ;;  %v291_v37 = vpack.c.bf16 %v276_v34, %v275_v33  ;;  %v2205_v43 = vld [vmem:[#allocation7 + $0xf0] sm:$0xff]   ;;  %v2207_v46 = vld [vmem:[#allocation7 + $0x68] sm:$0xff]   ;;  %s2439_s16 = scalar_lea.vmem %s3500_s29, 2048  ;;  %p3650_p10 = scmp.ne.s32.totalorder %s3566_s30, 0 }
  0x68   : > { %v2200_v38 = vld [vmem:[#allocation7 + $0x38] sm:$0xff]   ;;  %v2204_v44 = vld [vmem:[#allocation7 + $0x30] sm:$0xff]   ;;  %v2209_v47 = vld [vmem:[#allocation7 + $0xe8] sm:$0xff]   ;;  %p2440_p11 = scmp.ne.s32.totalorder %s3500_s29, %s2439_s16  ;;  %s2519_s22 = smov [#allocation8]  }
  0x69   : > { %520 = vmatpush1.bf16.msra.mxu0 %v2173_v15  ;;  %633 = vmatpush1.bf16.msra.mxu1 %v2174_v16  ;;  %v2202_v39 = vld [vmem:[#allocation7 + $0xb8] sm:$0xff]   ;;  %v2206_v45 = vld [vmem:[#allocation7 + $0xb0] sm:$0xff]   ;;  %v2208_v49 = vld [vmem:[#allocation7 + $0x28] sm:$0xff]   ;;  %s2443_s27 = sshll.u32 %s2519_s22, 4  ;;  %s2444_s27 = int_to_ptr.vmem [resolvable:$false] %s2443_s27 }
  0x6a   : > { %521 = vmatprep.subr.bf16.mxu0 %v2175_v17  ;;  %634 = vmatprep.subr.bf16.mxu1 %v2177_v18  ;;  %v278_v42 = vld [vmem:[%s2685_s6 + $0x18] sm:$0xff]  ;;  %v2210_v50 = vld [vmem:[#allocation7 + $0xa8] sm:$0xff]   ;;  %v2211_v51 = vld [vmem:[#allocation7 + $0x60] sm:$0xff]   ;;  %p2441_p1 = pnand %p2440_p11, %p3650_p10  ;;  %s2445_s7 = scalar_lea.vmem %s2444_s27, 4096 }
  0x6b   : > { %v292_v48 = vpack.c.bf16 %v278_v42, %v277_v41  ;;  %v2213_v52 = vld [vmem:[#allocation7 + $0xe0] sm:$0xff]   ;;  %v280_v54 = vld [vmem:[%s2685_s6 + $0x28] sm:$0xff]  ;;  %v281_v57 = vld [vmem:[%s2685_s6 + $0x30] sm:$0xff]  ;;  %p2446_p6 = scmp.lt.s32.totalorder %s3500_s29, %s2444_s27  ;;  %p2447_p12 = scmp.lt.s32.totalorder %s2445_s7, %s2439_s16 }
  0x6c   : > { %v279_v53 = vld [vmem:[%s2685_s6 + $0x20] sm:$0xff]  ;;  %v282_v58 = vld [vmem:[%s2685_s6 + $0x38] sm:$0xff]  ;;  %v284_v61 = vld [vmem:[%s2685_s6 + $0x48] sm:$0xff]  ;;  %p2442_p2 = pneg %p2441_p1 }
  0x6d   : > { %522 = vmatpush1.bf16.msra.mxu0 %v2179_v19  ;;  %635 = vmatpush1.bf16.msra.mxu1 %v2180_v20  ;;  %v2212_v55 = vld [vmem:[#allocation7 + $0x20] sm:$0xff]   ;;  %v293_v56 = vpack.c.bf16 %v280_v54, %v279_v53  ;;  %v294_v59 = vpack.c.bf16 %v282_v58, %v281_v57  ;;  %v285_v63 = vld [vmem:[%s2685_s6 + $0x50] sm:$0xff]  ;;  %v286_v1 = vld [vmem:[%s2685_s6 + $0x58] sm:$0xff]  ;;  %p2448_p3 = por %p2447_p12, %p2446_p6 }
  0x6e   : > { %523 = vmatprep.subr.bf16.mxu0 %v2181_v21  ;;  %636 = vmatprep.subr.bf16.mxu1 %v2183_v22  ;;  %v283_v60 = vld [vmem:[%s2685_s6 + $0x40] sm:$0xff]  ;;  %v296_v2 = vpack.c.bf16 %v286_v1, %v285_v63  ;;  %v288_v4 = vld [vmem:[%s2685_s6 + $0x68] sm:$0xff]  ;;  %v289_v6 = vld [vmem:[%s2685_s6 + $0x70] sm:$0xff] }
  0x6f   : > { %v295_v62 = vpack.c.bf16 %v284_v61, %v283_v60  ;;  %v287_v3 = vld [vmem:[%s2685_s6 + $0x60] sm:$0xff]  ;;  %v290_v7 = vld [vmem:[%s2685_s6 + $0x78] sm:$0xff]  ;;  %v2219_v14 = vld [vmem:[#allocation7 + $0x50] sm:$0xff]   ;;  %p2449_p9 = pnand %p2448_p3, %p2442_p2 }
  0x70   : > { %v297_v5 = vpack.c.bf16 %v288_v4, %v287_v3  ;;  %v298_v8 = vpack.c.bf16 %v290_v7, %v289_v6  ;;  %v2214_v9 = vld [vmem:[#allocation7 + $0xa0] sm:$0xff]   ;;  %v2215_v10 = vld [vmem:[#allocation7 + $0x58] sm:$0xff]   ;;  %v2221_v15 = vld [vmem:[#allocation7 + $0xd0] sm:$0xff]  }
  0x71   : > { %524 = vmatpush1.bf16.msra.mxu0 %v2185_v23  ;;  %637 = vmatpush1.bf16.msra.mxu1 %v2186_v24  ;;  %v2217_v11 = vld [vmem:[#allocation7 + $0xd8] sm:$0xff]   ;;  %v2220_v16 = vld [vmem:[#allocation7 + $0x10] sm:$0xff]   ;;  %v2223_v17 = vld [vmem:[#allocation7 + $0x48] sm:$0xff]  }
  0x72   : > { %525 = vmatprep.subr.bf16.mxu0 %v2187_v25  ;;  %638 = vmatprep.subr.bf16.mxu1 %v2189_v26  ;;  %v2216_v12 = vld [vmem:[#allocation7 + $0x18] sm:$0xff]   ;;  %v2225_v18 = vld [vmem:[#allocation7 + $0xc8] sm:$0xff]   ;;  %v2227_v21 = vld [vmem:[#allocation7 + $0x40] sm:$0xff]   ;;  %v333_v25 = vlaneseq }
  0x73   : > { %v2218_v13 = vld [vmem:[#allocation7 + $0x98] sm:$0xff]   ;;  %v2224_v19 = vld [vmem:[#allocation7 + $0x8] sm:$0xff]   ;;  %v2229_v22 = vld [vmem:[#allocation7 + $0xc0] sm:$0xff]  }
  0x74   : > { %v2226_v20 = vld [vmem:[#allocation7 + $0x88] sm:$0xff]   ;;  %v2228_v23 = vld [vmem:[#allocation7] sm:$0xff]   ;;  %v334_v26 = vshrl.u32 %v333_v25, 7 }
  0x75   : > { %526 = vmatpush1.bf16.msra.mxu0 %v2191_v27  ;;  %639 = vmatpush1.bf16.msra.mxu1 %v2192_v28  ;;  %v2230_v24 = vld [vmem:[#allocation7 + $0x80] sm:$0xff]  }
  0x76   : > { %527 = vmatprep.subr.bf16.mxu0 %v2193_v29  ;;  %640 = vmatprep.subr.bf16.mxu1 %v2195_v30  ;;  %v335_v27 = vsub.s32 0, %v334_v26  ;;  %v343_v28 = vsub.s32 2, %v334_v26  ;;  %v331_v29 = vld [vmem:[%s3546_s2] sm:$0xf]  ;;  %v339_v30 = vsub.s32 1, %v334_v26 }
  0x78   : > { %v2732_v33 = vrot.slane %v331_v29, %v343_v28 }
  0x79   : > { %528 = vmatpush1.bf16.msra.mxu0 %v2197_v31  ;;  %641 = vmatpush1.bf16.msra.mxu1 %v2198_v32  ;;  %v347_v31 = vsub.s32 3, %v334_v26  ;;  %v2730_v32 = vrot.slane %v331_v29, %v335_v27 }
  0x7a   : > { %1947 = vmatprep.subr.bf16.mxu0 %v2199_v35  ;;  %2011 = vmatprep.subr.bf16.mxu1 %v2201_v36  ;;  %v2734_v36 = vrot.slane %v331_v29, %v339_v30 }
  0x7c   : > { %546 = vmatmul.mubr.bf16.vlgmr.msra.gmra.mxu0 %v291_v37  ;;  %659 = vmatmul.mubr.bf16.vlgmr.msra.gmra.mxu1 %v291_v37  ;;  %v2736_v37 = vrot.slane %v331_v29, %v347_v31 }
  0x7d   : > { %555 = vmatprep.mubr.bf16.mxu0 %v2518_v0  ;;  %668 = vmatprep.mubr.bf16.mxu1 %v2518_v0 }
  0x7e   : > { %1948 = vmatpush3.bf16.msra.mxu0 %v2200_v38  ;;  %2012 = vmatpush3.bf16.msra.mxu1 %v2202_v39 }
  0x7f   : > { %1949 = vmatprep.subr.bf16.mxu0 %v2203_v40  ;;  %2013 = vmatprep.subr.bf16.mxu1 %v2205_v43 }
  0x82   : > { %1950 = vmatpush3.bf16.msra.mxu0 %v2204_v44  ;;  %2014 = vmatpush3.bf16.msra.mxu1 %v2206_v45 }
  0x83   : > { %1951 = vmatprep.subr.bf16.mxu0 %v2207_v46  ;;  %2015 = vmatprep.subr.bf16.mxu1 %v2209_v47 }
  0x84   : > { %556 = vmatmul.mubr.bf16.gmra.mxu0 %v292_v48  ;;  %669 = vmatmul.mubr.bf16.gmra.mxu1 %v292_v48 }
  0x85   : > { %565 = vmatprep.mubr.bf16.mxu0 %v2518_v0  ;;  %678 = vmatprep.mubr.bf16.mxu1 %v2518_v0 }
  0x86   : > { %1952 = vmatpush3.bf16.msra.mxu0 %v2208_v49  ;;  %2016 = vmatpush3.bf16.msra.mxu1 %v2210_v50 }
  0x87   : > { %1953 = vmatprep.subr.bf16.mxu0 %v2211_v51  ;;  %2017 = vmatprep.subr.bf16.mxu1 %v2213_v52 }
  0x8a   : > { %1954 = vmatpush3.bf16.msra.mxu0 %v2212_v55  ;;  %2018 = vmatpush3.bf16.msra.mxu1 %v2214_v9 }
  0x8b   : > { %1955 = vmatprep.subr.bf16.mxu0 %v2215_v10  ;;  %2019 = vmatprep.subr.bf16.mxu1 %v2217_v11 }
  0x8c   : > { %566 = vmatmul.mubr.bf16.gmra.mxu0 %v293_v56  ;;  %679 = vmatmul.mubr.bf16.gmra.mxu1 %v293_v56 }
  0x8d   : > { %575 = vmatprep.mubr.bf16.mxu0 %v2518_v0  ;;  %688 = vmatprep.mubr.bf16.mxu1 %v2518_v0 }
  0x8e   : > { %1956 = vmatpush3.bf16.msra.mxu0 %v2216_v12  ;;  %2020 = vmatpush3.bf16.msra.mxu1 %v2218_v13 }
  0x8f   : > { %1957 = vmatprep.subr.bf16.mxu0 %v2219_v14  ;;  %2021 = vmatprep.subr.bf16.mxu1 %v2221_v15 }
  0x92   : > { %1958 = vmatpush3.bf16.msra.mxu0 %v2220_v16 }
  0x93   : > { %1959 = vmatprep.subr.bf16.mxu0 %v2223_v17 }
  0x94   : > { %576 = vmatmul.mubr.bf16.gmra.mxu0 %v294_v59  ;;  %689 = vmatmul.mubr.bf16.gmra.mxu1 %v294_v59 }
  0x95   : > { %585 = vmatprep.mubr.bf16.mxu0 %v2518_v0  ;;  %698 = vmatprep.mubr.bf16.mxu1 %v2518_v0 }
  0x96   : > { %1960 = vmatpush3.bf16.msra.mxu0 %v2224_v19 }
  0x97   : > { %1961 = vmatprep.subr.bf16.mxu0 %v2227_v21 }
  0x9a   : > { %1962 = vmatpush3.bf16.msra.mxu0 %v2228_v23 }
  0x9c   : > { %586 = vmatmul.mubr.bf16.gmra.mxu0 %v295_v62  ;;  %699 = vmatmul.mubr.bf16.gmra.mxu1 %v295_v62 }
  0x9d   : > { %595 = vmatprep.mubr.bf16.mxu0 %v2518_v0  ;;  %708 = vmatprep.mubr.bf16.mxu1 %v2518_v0 }
  0xa4   : > { %596 = vmatmul.mubr.bf16.gmra.mxu0 %v296_v2  ;;  %709 = vmatmul.mubr.bf16.gmra.mxu1 %v296_v2 }
  0xa5   : > { %605 = vmatprep.mubr.bf16.mxu0 %v2518_v0  ;;  %718 = vmatprep.mubr.bf16.mxu1 %v2518_v0 }
  0xac   : > { %606 = vmatmul.mubr.bf16.gmra.mxu0 %v297_v5  ;;  %719 = vmatmul.mubr.bf16.gmra.mxu1 %v297_v5 }
  0xad   : > { %615 = vmatprep.mubr.bf16.mxu0 %v2518_v0  ;;  %728 = vmatprep.mubr.bf16.mxu1 %v2518_v0  ;;  %v2222_v0 = vld [vmem:[#allocation7 + $0x90] sm:$0xff]  }
  0xae   : > { %2022 = vmatpush3.bf16.msra.mxu1 %v2222_v0 }
  0xaf   : > { %2023 = vmatprep.subr.bf16.mxu1 %v2225_v18 }
  0xb2   : > { %2024 = vmatpush3.bf16.msra.mxu1 %v2226_v20 }
  0xb3   : > { %2025 = vmatprep.subr.bf16.mxu1 %v2229_v22 }
  0xb4   : > { %616 = vmatmul.mubr.bf16.gmra.mxu0 %v298_v8  ;;  %729 = vmatmul.mubr.bf16.gmra.mxu1 %v298_v8 }
  0xb6   : > { %2026 = vmatpush3.bf16.msra.mxu1 %v2230_v24 }
 0x13c   : > { %v547_v34 = vpop.f32.mrf.mxu0  ;;  %v660_v35 = vpop.f32.mrf.mxu1 }
 0x13d   : > { %v548_v38 = vadd.f32 %v547_v34, %v2730_v32  ;;  %v661_v39 = vadd.f32 %v660_v35, %v2732_v33 }
 0x13e   : > { %v549_v40 = vpop.f32.mrf.mxu0  ;;  %v662_v41 = vpop.f32.mrf.mxu1 }
 0x13f   : > { %v739_v42 = vmul.f32 %v548_v38, %v548_v38  ;;  %v741_v43 = vmul.f32 %v661_v39, %v661_v39  ;;  %v2741_v44 = vadd.f32 %v549_v40, %v2734_v36  ;;  %v2744_v45 = vadd.f32 %v662_v41, %v2736_v37 }
 0x140   : > { %v551_v46 = vpop.f32.mrf.mxu0  ;;  %v664_v47 = vpop.f32.mrf.mxu1  ;;  %v2767_v23 = vmul.f32 0.5, %v548_v38  ;;  %v2775_v34 = vmul.f32 0.5, %v661_v39 }
 0x141   : > { %v867_v48 = vmul.f32 0.035677407, %v739_v42  ;;  %v869_v49 = vmul.f32 0.035677407, %v741_v43  ;;  %v2747_v50 = vadd.f32 %v551_v46, %v2730_v32  ;;  %v2750_v51 = vadd.f32 %v664_v47, %v2732_v33 }
 0x142   : > { %v553_v52 = vpop.f32.mrf.mxu0  ;;  %v666_v53 = vpop.f32.mrf.mxu1  ;;  %v740_v60 = vmul.f32 %v2741_v44, %v2741_v44  ;;  %v742_v61 = vmul.f32 %v2744_v45, %v2744_v45  ;;  %v2778_v41 = vmul.f32 0.5, %v2741_v44 }
 0x143   : > { %v931_v54 = vadd.f32 0.7978846, %v867_v48  ;;  %v933_v55 = vadd.f32 0.7978846, %v869_v49  ;;  %v743_v56 = vmul.f32 %v2747_v50, %v2747_v50  ;;  %v745_v57 = vmul.f32 %v2750_v51, %v2750_v51 }
 0x144   : > { %v557_v58 = vpop.f32.mrf.mxu0  ;;  %v670_v59 = vpop.f32.mrf.mxu1  ;;  %v554_v63 = vadd.f32 %v553_v52, %v2734_v36  ;;  %v667_v3 = vadd.f32 %v666_v53, %v2736_v37  ;;  %v868_v11 = vmul.f32 0.035677407, %v740_v60  ;;  %v870_v12 = vmul.f32 0.035677407, %v742_v61 }
 0x145   : > { %v871_v62 = vmul.f32 0.035677407, %v743_v56  ;;  %v995_v1 = vmul.f32 %v931_v54, %v548_v38  ;;  %v873_v2 = vmul.f32 0.035677407, %v745_v57  ;;  %v997_v6 = vmul.f32 %v933_v55, %v661_v39 }
 0x146   : > { %v559_v4 = vpop.f32.mrf.mxu0  ;;  %v672_v5 = vpop.f32.mrf.mxu1  ;;  %v744_v9 = vmul.f32 %v554_v63, %v554_v63  ;;  %v746_v14 = vmul.f32 %v667_v3, %v667_v3  ;;  %v558_v15 = vadd.f32 %v557_v58, %v2730_v32  ;;  %v671_v16 = vadd.f32 %v670_v59, %v2732_v33 }
 0x147   : > { %v935_v7 = vadd.f32 0.7978846, %v871_v62  ;;  %v937_v8 = vadd.f32 0.7978846, %v873_v2  ;;  %2231 = vtanh.f32 %v995_v1  ;;  %v560_v17 = vadd.f32 %v559_v4, %v2734_v36 }
 0x148   : > { %v561_v10 = vpop.f32.mrf.mxu0  ;;  %v674_v13 = vpop.f32.mrf.mxu1  ;;  %2233 = vtanh.f32 %v997_v6  ;;  %v872_v19 = vmul.f32 0.035677407, %v744_v9  ;;  %v747_v20 = vmul.f32 %v558_v15, %v558_v15  ;;  %v749_v21 = vmul.f32 %v671_v16, %v671_v16 }
 0x149   : > { %v999_v0 = vmul.f32 %v935_v7, %v2747_v50  ;;  %v1001_v18 = vmul.f32 %v937_v8, %v2750_v51  ;;  %v932_v25 = vadd.f32 0.7978846, %v868_v11  ;;  %v934_v26 = vadd.f32 0.7978846, %v870_v12 }
 0x14a   : > { %v563_v22 = vpop.f32.mrf.mxu0  ;;  %v676_v24 = vpop.f32.mrf.mxu1  ;;  %v874_v27 = vmul.f32 0.035677407, %v746_v14  ;;  %v748_v28 = vmul.f32 %v560_v17, %v560_v17  ;;  %v875_v29 = vmul.f32 0.035677407, %v747_v20  ;;  %v2770_v30 = vadd.f32 %v672_v5, %v2736_v37 }
 0x14b   : > { %2235 = vtanh.f32 %v999_v0  ;;  %v2773_v31 = vadd.f32 %v561_v10, %v2730_v32  ;;  %v936_v35 = vadd.f32 0.7978846, %v872_v19  ;;  %v877_v40 = vmul.f32 0.035677407, %v749_v21 }
 0x14c   : > { %2237 = vtanh.f32 %v1001_v18  ;;  %v567_v38 = vpop.f32.mrf.mxu0  ;;  %v876_v42 = vmul.f32 0.035677407, %v748_v28  ;;  %v750_v43 = vmul.f32 %v2770_v30, %v2770_v30  ;;  %v2783_v46 = vadd.f32 %v674_v13, %v2732_v33  ;;  %v680_v47 = vpop.f32.mrf.mxu1 }
 0x14d   : > { %v996_v48 = vmul.f32 %v932_v25, %v2741_v44  ;;  %v2787_v39 = vmul.f32 0.5, %v2744_v45  ;;  %v938_v49 = vadd.f32 0.7978846, %v874_v27  ;;  %v751_v52 = vmul.f32 %v2773_v31, %v2773_v31 }
 0x14e   : > { %v998_v53 = vmul.f32 %v934_v26, %v2744_v45  ;;  %v2793_v54 = vmul.f32 0.5, %v2747_v50  ;;  %v2796_v55 = vmul.f32 0.5, %v2750_v51  ;;  %v939_v56 = vadd.f32 0.7978846, %v875_v29  ;;  %v569_v60 = vpop.f32.mrf.mxu0  ;;  %v682_v50 = vpop.f32.mrf.mxu1 }
 0x14f   : > { %v2798_v57 = vmul.f32 0.5, %v554_v63  ;;  %v1000_v58 = vmul.f32 %v936_v35, %v554_v63  ;;  %v941_v44 = vadd.f32 0.7978846, %v877_v40  ;;  %v2801_v59 = vadd.f32 %v563_v22, %v2734_v36 }
 0x150   : > { %v2803_v61 = vmul.f32 0.5, %v667_v3  ;;  %v940_v62 = vadd.f32 0.7978846, %v876_v42  ;;  %v878_v1 = vmul.f32 0.035677407, %v750_v43  ;;  %v753_v45 = vmul.f32 %v2783_v46, %v2783_v46  ;;  %v684_v18 = vpop.f32.mrf.mxu1 }
 0x151   : > { %2239 = vtanh.f32 %v996_v48  ;;  %v1002_v51 = vmul.f32 %v938_v49, %v667_v3  ;;  %v879_v2 = vmul.f32 0.035677407, %v751_v52  ;;  %v2808_v4 = vadd.f32 %v676_v24, %v2736_v37  ;;  %v571_v3 = vpop.f32.mrf.mxu0 }
 0x152   : > { %2241 = vtanh.f32 %v998_v53  ;;  %v2810_v5 = vmul.f32 0.5, %v558_v15  ;;  %v1003_v6 = vmul.f32 %v939_v56, %v558_v15  ;;  %v2812_v7 = vmul.f32 0.5, %v671_v16 }
 0x153   : > { %2243 = vtanh.f32 %v1000_v58  ;;  %v1005_v9 = vmul.f32 %v941_v44, %v671_v16  ;;  %v2814_v10 = vmul.f32 0.5, %v560_v17  ;;  %v752_v11 = vmul.f32 %v2801_v59, %v2801_v59  ;;  %v573_v27 = vpop.f32.mrf.mxu0 }
 0x154   : > { %v2232_v63 = vpop.eup %2231  ;;  %v1004_v12 = vmul.f32 %v940_v62, %v560_v17  ;;  %v942_v13 = vadd.f32 0.7978846, %v878_v1  ;;  %v881_v14 = vmul.f32 0.035677407, %v753_v45  ;;  %v2819_v0 = vadd.f32 %v567_v38, %v2730_v32  ;;  %v686_v38 = vpop.f32.mrf.mxu1 }
 0x155   : > { %v2234_v8 = vpop.eup %2233  ;;  %2245 = vtanh.f32 %v1002_v51  ;;  %v943_v15 = vadd.f32 0.7978846, %v879_v2  ;;  %v754_v19 = vmul.f32 %v2808_v4, %v2808_v4  ;;  %v2824_v16 = vadd.f32 %v680_v47, %v2732_v33 }
 0x156   : > { %v1123_v20 = vadd.f32 1.0, %v2232_v63  ;;  %2247 = vtanh.f32 %v1003_v6  ;;  %v2827_v21 = vmul.f32 0.5, %v2770_v30  ;;  %v2830_v17 = vmul.f32 0.5, %v2773_v31  ;;  %v690_v45 = vpop.f32.mrf.mxu1 }
 0x157   : > { %v1125_v24 = vadd.f32 1.0, %v2234_v8  ;;  %2249 = vtanh.f32 %v1005_v9  ;;  %v2833_v25 = vmul.f32 0.5, %v2783_v46  ;;  %v880_v26 = vmul.f32 0.035677407, %v752_v11 }
 0x158   : > { %v2236_v22 = vpop.eup %2235  ;;  %2251 = vtanh.f32 %v1004_v12  ;;  %v1006_v29 = vmul.f32 %v942_v13, %v2770_v30  ;;  %v945_v35 = vadd.f32 0.7978846, %v881_v14  ;;  %v755_v40 = vmul.f32 %v2819_v0, %v2819_v0 }
 0x159   : > { %v2238_v28 = vpop.eup %2237  ;;  %v1007_v42 = vmul.f32 %v943_v15, %v2773_v31  ;;  %v882_v43 = vmul.f32 0.035677407, %v754_v19  ;;  %v757_v47 = vmul.f32 %v2824_v16, %v2824_v16  ;;  %v2842_v48 = vadd.f32 %v569_v60, %v2734_v36  ;;  %v577_v60 = vpop.f32.mrf.mxu0 }
 0x15a   : > { %v2845_v49 = vmul.f32 %v1123_v20, %v2767_v23  ;;  %v1127_v52 = vadd.f32 1.0, %v2236_v22  ;;  %v2848_v30 = vmul.f32 0.5, %v2801_v59  ;;  %v2851_v53 = vadd.f32 %v682_v50, %v2736_v37  ;;  %v692_v19 = vpop.f32.mrf.mxu1 }
 0x15b   : > { %v2854_v56 = vmul.f32 %v1125_v24, %v2775_v34  ;;  %v1129_v31 = vadd.f32 1.0, %v2238_v28  ;;  %v944_v58 = vadd.f32 0.7978846, %v880_v26  ;;  %v2857_v44 = vadd.f32 %v571_v3, %v2730_v32  ;;  %v579_v13 = vpop.f32.mrf.mxu0 }
 0x15c   : > { %2253 = vtanh.f32 %v1006_v29  ;;  %v1009_v23 = vmul.f32 %v945_v35, %v2783_v46  ;;  %v2861_v62 = vmul.f32 0.5, %v2808_v4  ;;  %v883_v1 = vmul.f32 0.035677407, %v755_v40 }
 0x15d   : > { %2255 = vtanh.f32 %v1007_v42  ;;  %v946_v50 = vadd.f32 0.7978846, %v882_v43  ;;  %v885_v51 = vmul.f32 0.035677407, %v757_v47  ;;  %v756_v34 = vmul.f32 %v2842_v48, %v2842_v48  ;;  %v581_v43 = vpop.f32.mrf.mxu0 }
 0x15e   : > { %v2865_v2 = vpop.eup %2239  ;;  %v2868_v63 = vmul.f32 %v1127_v52, %v2793_v54  ;;  %v758_v6 = vmul.f32 %v2851_v53, %v2851_v53  ;;  %v2873_v46 = vadd.f32 %v684_v18, %v2732_v33  ;;  %v2876_v8 = vadd.f32 %v573_v27, %v2734_v36 }
 0x15f   : > { %v2878_v9 = vpop.eup %2241  ;;  %v2881_v11 = vmul.f32 %v1129_v31, %v2796_v55  ;;  %v1008_v3 = vmul.f32 %v944_v58, %v2801_v59  ;;  %v759_v54 = vmul.f32 %v2857_v44, %v2857_v44  ;;  %v2887_v12 = vadd.f32 %v686_v38, %v2736_v37 }
 0x160   : > { %v2889_v14 = vpop.eup %2243  ;;  %2257 = vtanh.f32 %v1009_v23  ;;  %v2892_v18 = vmul.f32 0.5, %v2819_v0  ;;  %v947_v15 = vadd.f32 0.7978846, %v883_v1  ;;  %v761_v55 = vmul.f32 %v2873_v46, %v2873_v46  ;;  %v694_v1 = vpop.f32.mrf.mxu1 }
 0x161   : > { %v1010_v59 = vmul.f32 %v946_v50, %v2808_v4  ;;  %v949_v20 = vadd.f32 0.7978846, %v885_v51  ;;  %v884_v22 = vmul.f32 0.035677407, %v756_v34  ;;  %v760_v24 = vmul.f32 %v2876_v8, %v2876_v8 }
 0x162   : > { %3572 = vst [vmem:[#allocation12_spill] sm:$0xff] %v2892_v18  ;;  %v2899_v26 = vpop.eup %2245  ;;  %v2904_v28 = vmul.f32 0.5, %v2824_v16  ;;  %v886_v29 = vmul.f32 0.035677407, %v758_v6  ;;  %v762_v35 = vmul.f32 %v2887_v12, %v2887_v12  ;;  %2259 = vtanh.f32 %v1008_v3 }
 0x163   : > { %v2908_v40 = vpop.eup %2247  ;;  %v887_v38 = vmul.f32 0.035677407, %v759_v54  ;;  %v2913_v42 = vadd.f32 %v577_v60, %v2730_v32  ;;  %v1011_v52 = vmul.f32 %v947_v15, %v2819_v0  ;;  %v2919_v31 = vmul.f32 0.5, %v2842_v48 }
 0x164   : > { %3573 = vst [vmem:[#allocation13_spill] sm:$0xff] %v2904_v28  ;;  %v2915_v47 = vpop.eup %2249  ;;  %v889_v58 = vmul.f32 0.035677407, %v761_v55  ;;  %v2922_v23 = vadd.f32 %v690_v45, %v2732_v33  ;;  %2261 = vtanh.f32 %v1010_v59  ;;  %v1013_v51 = vmul.f32 %v949_v20, %v2824_v16  ;;  %v583_v16 = vpop.f32.mrf.mxu0 }
 0x165   : > { %3574 = vst [vmem:[#allocation14_spill] sm:$0xff] %v2919_v31  ;;  %v2924_v50 = vpop.eup %2251  ;;  %v948_v60 = vadd.f32 0.7978846, %v884_v22  ;;  %v888_v34 = vmul.f32 0.035677407, %v760_v24  ;;  %v2928_v6 = vmul.f32 0.5, %v2851_v53  ;;  %v763_v45 = vmul.f32 %v2913_v42, %v2913_v42 }
 0x166   : > { %v950_v3 = vadd.f32 0.7978846, %v886_v29  ;;  %v2931_v0 = vmul.f32 0.5, %v2857_v44  ;;  %v890_v54 = vmul.f32 0.035677407, %v762_v35  ;;  %v2936_v55 = vadd.f32 %v579_v13, %v2734_v36  ;;  %v696_v29 = vpop.f32.mrf.mxu1 }
 0x167   : > { %3575 = vst [vmem:[#allocation15_spill] sm:$0xff] %v2928_v6  ;;  %v951_v15 = vadd.f32 0.7978846, %v887_v38  ;;  %v2939_v59 = vadd.f32 %v692_v19, %v2736_v37  ;;  %2263 = vtanh.f32 %v1011_v52  ;;  %v953_v20 = vadd.f32 0.7978846, %v889_v58 }
 0x168   : > { %3576 = vst [vmem:[#allocation16_spill] sm:$0xff] %v2931_v0  ;;  %v765_v22 = vmul.f32 %v2922_v23, %v2922_v23  ;;  %v2944_v24 = vadd.f32 %v581_v43, %v2730_v32  ;;  %2265 = vtanh.f32 %v1013_v51  ;;  %v1012_v38 = vmul.f32 %v948_v60, %v2842_v48  ;;  %v700_v18 = vpop.f32.mrf.mxu1 }
 0x169   : > { %v2946_v35 = vpop.eup %2253  ;;  %v952_v13 = vadd.f32 0.7978846, %v888_v34  ;;  %v764_v19 = vmul.f32 %v2936_v55, %v2936_v55  ;;  %v1014_v52 = vmul.f32 %v950_v3, %v2851_v53  ;;  %v954_v58 = vadd.f32 0.7978846, %v890_v54  ;;  %v587_v34 = vpop.f32.mrf.mxu0 }
 0x16a   : > { %v2951_v4 = vpop.eup %2255  ;;  %v766_v27 = vmul.f32 %v2939_v59, %v2939_v59  ;;  %v2957_v43 = vadd.f32 %v694_v1, %v2732_v33  ;;  %v1015_v28 = vmul.f32 %v951_v15, %v2857_v44  ;;  %v2961_v51 = vmul.f32 0.5, %v2873_v46 }
 0x16b   : > { %v2964_v48 = vmul.f32 0.5, %v2876_v8  ;;  %v891_v60 = vmul.f32 0.035677407, %v763_v45  ;;  %v1017_v0 = vmul.f32 %v953_v20, %v2873_v46  ;;  %v893_v53 = vmul.f32 0.035677407, %v765_v22 }
 0x16c   : > { %3577 = vst [vmem:[#allocation17_spill] sm:$0xff] %v2961_v51  ;;  %v892_v3 = vmul.f32 0.035677407, %v764_v19  ;;  %v767_v54 = vmul.f32 %v2944_v24, %v2944_v24  ;;  %2267 = vtanh.f32 %v1012_v38  ;;  %v1016_v44 = vmul.f32 %v952_v13, %v2876_v8  ;;  %v589_v13 = vpop.f32.mrf.mxu0 }
 0x16d   : > { %3578 = vst [vmem:[#allocation18_spill] sm:$0xff] %v2964_v48  ;;  %v2969_v1 = vpop.eup %2257  ;;  %v2973_v15 = vmul.f32 0.5, %v2887_v12  ;;  %v2976_v51 = vadd.f32 %v583_v16, %v2734_v36  ;;  %2269 = vtanh.f32 %v1014_v52  ;;  %v1018_v46 = vmul.f32 %v954_v58, %v2887_v12  ;;  %v702_v12 = vpop.f32.mrf.mxu1 }
 0x16e   : > { %v894_v45 = vmul.f32 0.035677407, %v766_v27  ;;  %v769_v20 = vmul.f32 %v2957_v43, %v2957_v43  ;;  %2271 = vtanh.f32 %v1015_v28  ;;  %v2982_v22 = vmul.f32 0.5, %v2913_v42 }
 0x16f   : > { %3579 = vst [vmem:[#allocation19_spill] sm:$0xff] %v2973_v15  ;;  %v955_v38 = vadd.f32 0.7978846, %v891_v60  ;;  %v2985_v8 = vadd.f32 %v696_v29, %v2736_v37  ;;  %v2987_v19 = vpop.eup %2259  ;;  %2273 = vtanh.f32 %v1017_v0  ;;  %v957_v16 = vadd.f32 0.7978846, %v893_v53 }
 0x170   : > { %3580 = vst [vmem:[#allocation20_spill] sm:$0xff] %v2982_v22  ;;  %v956_v52 = vadd.f32 0.7978846, %v892_v3  ;;  %v895_v15 = vmul.f32 0.035677407, %v767_v54  ;;  %2275 = vtanh.f32 %v1016_v44  ;;  %v2990_v27 = vmul.f32 0.5, %v2922_v23 }
 0x171   : > { %v768_v28 = vmul.f32 %v2976_v51, %v2976_v51  ;;  %v2995_v58 = vadd.f32 %v587_v34, %v2730_v32  ;;  %v2997_v29 = vpop.eup %2261  ;;  %2277 = vtanh.f32 %v1018_v46  ;;  %v3000_v60 = vmul.f32 0.5, %v2936_v55  ;;  %v591_v34 = vpop.f32.mrf.mxu0 }
 0x172   : > { %3581 = vst [vmem:[#allocation21_spill] sm:$0xff] %v2990_v27  ;;  %v958_v0 = vadd.f32 0.7978846, %v894_v45  ;;  %v897_v53 = vmul.f32 0.035677407, %v769_v20  ;;  %v1019_v3 = vmul.f32 %v955_v38, %v2913_v42  ;;  %v3004_v54 = vmul.f32 0.5, %v2939_v59  ;;  %v704_v20 = vpop.f32.mrf.mxu1 }
 0x173   : > { %3582 = vst [vmem:[#allocation22_spill] sm:$0xff] %v3000_v60  ;;  %v770_v44 = vmul.f32 %v2985_v8, %v2985_v8  ;;  %v3009_v27 = vadd.f32 %v700_v18, %v2732_v33  ;;  %v1021_v22 = vmul.f32 %v957_v16, %v2922_v23  ;;  %v1020_v46 = vmul.f32 %v956_v52, %v2936_v55 }
 0x174   : > { %3583 = vst [vmem:[#allocation23_spill] sm:$0xff] %v3004_v54  ;;  %v3014_v60 = vmul.f32 0.5, %v2944_v24  ;;  %v959_v45 = vadd.f32 0.7978846, %v895_v15  ;;  %v3016_v42 = vpop.eup %2263  ;;  %v896_v38 = vmul.f32 0.035677407, %v768_v28  ;;  %v771_v54 = vmul.f32 %v2995_v58, %v2995_v58 }
 0x175   : > { %3585 = vst [vmem:[#allocation25_spill] sm:$0xff] %v3016_v42  ;;  %v3021_v6 = vadd.f32 %v589_v13, %v2734_v36  ;;  %v3024_v18 = vadd.f32 %v702_v12, %v2736_v37  ;;  %v3026_v23 = vpop.eup %2265  ;;  %v1022_v55 = vmul.f32 %v958_v0, %v2939_v59  ;;  %v3030_v16 = vmul.f32 0.5, %v2957_v43 }
 0x176   : > { %3584 = vst [vmem:[#allocation24_spill] sm:$0xff] %v3014_v60  ;;  %3586 = vst [vmem:[#allocation26_spill] sm:$0xff] %v3026_v23  ;;  %v961_v15 = vadd.f32 0.7978846, %v897_v53  ;;  %v3033_v52 = vadd.f32 %v591_v34, %v2730_v32  ;;  %2279 = vtanh.f32 %v1019_v3  ;;  %v898_v28 = vmul.f32 0.035677407, %v770_v44  ;;  %v706_v23 = vpop.f32.mrf.mxu1 }
 0x177   : > { %3587 = vst [vmem:[#allocation27_spill] sm:$0xff] %v3030_v16  ;;  %v773_v13 = vmul.f32 %v3009_v27, %v3009_v27  ;;  %v3038_v60 = vadd.f32 %v704_v20, %v2732_v33  ;;  %2281 = vtanh.f32 %v1021_v22  ;;  %v1023_v12 = vmul.f32 %v959_v45, %v2944_v24  ;;  %v593_v45 = vpop.f32.mrf.mxu0 }
 0x178   : > { %v3042_v59 = vmul.f32 0.5, %v2976_v51  ;;  %v772_v0 = vmul.f32 %v3021_v6, %v3021_v6  ;;  %2283 = vtanh.f32 %v1020_v46  ;;  %v960_v53 = vadd.f32 0.7978846, %v896_v38 }
 0x179   : > { %v899_v34 = vmul.f32 0.035677407, %v771_v54  ;;  %v774_v3 = vmul.f32 %v3024_v18, %v3024_v18  ;;  %v3048_v44 = vpop.eup %2267  ;;  %2285 = vtanh.f32 %v1022_v55  ;;  %v1025_v20 = vmul.f32 %v961_v15, %v2957_v43 }
 0x17a   : > { %3588 = vst [vmem:[#allocation28_spill] sm:$0xff] %v3042_v59  ;;  %3589 = vst [vmem:[#allocation29_spill] sm:$0xff] %v3048_v44  ;;  %v3052_v22 = vmul.f32 0.5, %v2985_v8  ;;  %v775_v24 = vmul.f32 %v3033_v52, %v3033_v52  ;;  %v3056_v16 = vpop.eup %2269  ;;  %v962_v46 = vadd.f32 0.7978846, %v898_v28  ;;  %v777_v54 = vmul.f32 %v3038_v60, %v3038_v60 }
 0x17b   : > { %3591 = vst [vmem:[#allocation31_spill] sm:$0xff] %v3056_v16  ;;  %v901_v38 = vmul.f32 0.035677407, %v773_v13  ;;  %v1124_v59 = vadd.f32 1.0, %v2865_v2  ;;  %v3061_v55 = vpop.eup %2271  ;;  %2287 = vtanh.f32 %v1023_v12  ;;  %v3064_v43 = vmul.f32 0.5, %v2995_v58 }
 0x17c   : > { %3590 = vst [vmem:[#allocation30_spill] sm:$0xff] %v3052_v22  ;;  %3592 = vst [vmem:[#allocation32_spill] sm:$0xff] %v3061_v55  ;;  %v900_v15 = vmul.f32 0.035677407, %v772_v0  ;;  %v1128_v22 = vadd.f32 1.0, %v2889_v14  ;;  %v3067_v42 = vpop.eup %2273  ;;  %v1024_v28 = vmul.f32 %v960_v53, %v2976_v51  ;;  %v1126_v48 = vadd.f32 1.0, %v2878_v9  ;;  %v597_v0 = vpop.f32.mrf.mxu0 }
 0x17d   : > { %3593 = vst [vmem:[#allocation33_spill] sm:$0xff] %v3064_v43  ;;  %3594 = vst [vmem:[#allocation34_spill] sm:$0xff] %v3067_v42  ;;  %v963_v13 = vadd.f32 0.7978846, %v899_v34  ;;  %v902_v16 = vmul.f32 0.035677407, %v774_v3  ;;  %v3071_v31 = vpop.eup %2275  ;;  %v1188_v55 = vmul.f32 %v1124_v59, %v2778_v41  ;;  %v1026_v14 = vmul.f32 %v962_v46, %v2985_v8  ;;  %v710_v34 = vpop.f32.mrf.mxu1 }
 0x17e   : > { %v903_v2 = vmul.f32 0.035677407, %v775_v24  ;;  %v1192_v12 = vmul.f32 %v1128_v22, %v2798_v57  ;;  %v1130_v43 = vadd.f32 1.0, %v2899_v26  ;;  %v3076_v44 = vpop.eup %2277  ;;  %v965_v42 = vadd.f32 0.7978846, %v901_v38  ;;  %v599_v38 = vpop.f32.mrf.mxu0 }
 0x17f   : > { %3595 = vst [vmem:[#allocation35_spill] sm:$0xff] %v3076_v44  ;;  %v905_v51 = vmul.f32 0.035677407, %v777_v54  ;;  %v594_v53 = vadd.f32 %v593_v45, %v2734_v36  ;;  %v964_v9 = vadd.f32 0.7978846, %v900_v15  ;;  %v1190_v24 = vmul.f32 %v1126_v48, %v2787_v39 }
 0x180   : > { %v1252_v3 = vpack.c.bf16 %v1192_v12, %v1188_v55  ;;  %v1194_v41 = vmul.f32 %v1130_v43, %v2803_v61  ;;  %v1027_v57 = vmul.f32 %v963_v13, %v2995_v58  ;;  %v966_v59 = vadd.f32 0.7978846, %v902_v16 }
 0x181   : > { %v776_v26 = vmul.f32 %v594_v53, %v594_v53  ;;  %v3084_v22 = vadd.f32 %v706_v23, %v2736_v37  ;;  %v967_v44 = vadd.f32 0.7978846, %v903_v2  ;;  %v3087_v46 = vadd.f32 %v597_v0, %v2730_v32  ;;  %v712_v23 = vpop.f32.mrf.mxu1 }
 0x182   : > { %1578 = vmatprep.mubr.bf16.mxu0 %v1252_v3  ;;  %v1254_v8 = vpack.c.bf16 %v1194_v41, %v1190_v24  ;;  %v3090_v45 = vadd.f32 %v710_v34, %v2732_v33  ;;  %2289 = vtanh.f32 %v1025_v20  ;;  %v1029_v39 = vmul.f32 %v965_v42, %v3009_v27 }
 0x183   : > { %v969_v61 = vadd.f32 0.7978846, %v905_v51  ;;  %v904_v48 = vmul.f32 0.035677407, %v776_v26  ;;  %v3597_v58 = vpack.c.bf16 %v2868_v63, %v2845_v49  ;;  %v3096_v16 = vpop.eup %2279  ;;  %2291 = vtanh.f32 %v1024_v28  ;;  %v714_v51 = vpop.f32.mrf.mxu1 }
 0x184   : > { %3596 = vst [vmem:[#allocation36_spill] sm:$0xff] %v3090_v45  ;;  %v3099_v54 = vmul.f32 0.5, %v3009_v27  ;;  %v1028_v55 = vmul.f32 %v964_v9, %v3021_v6  ;;  %1675 = vmatprep.mubr.bf16.mxu1 %v1254_v8  ;;  %v778_v20 = vmul.f32 %v3084_v22, %v3084_v22  ;;  %v3104_v42 = vpop.eup %2281  ;;  %2293 = vtanh.f32 %v1026_v14  ;;  %v601_v14 = vpop.f32.mrf.mxu0 }
 0x185   : > { %1579 = vmatmul.mubr.bf16.vlgmr.msra.gmra.mxu0 %v3597_v58  ;;  %v1030_v43 = vmul.f32 %v966_v59, %v3024_v18  ;;  %v3599_v49 = vpack.c.bf16 %v2881_v11, %v2854_v56  ;;  %v779_v63 = vmul.f32 %v3087_v46, %v3087_v46  ;;  %v3113_v27 = vadd.f32 %v599_v38, %v2734_v36  ;;  %v3115_v15 = vpop.eup %2283 }
 0x186   : > { %3598 = vst [vmem:[#allocation37_spill] sm:$0xff] %v3099_v54  ;;  %2295 = vtanh.f32 %v1027_v57  ;;  %v3118_v28 = vmul.f32 0.5, %v3021_v6  ;;  %v1031_v13 = vmul.f32 %v967_v44, %v3033_v52  ;;  %v781_v2 = vmul.f32 %v3090_v45, %v3090_v45  ;;  %v3123_v12 = vpop.eup %2285 }
 0x187   : > { %1676 = vmatmul.mubr.bf16.vlgmr.msra.gmra.mxu1 %v3599_v49  ;;  %2297 = vtanh.f32 %v1029_v39  ;;  %v3126_v56 = vmul.f32 0.5, %v3024_v18  ;;  %v1033_v11 = vmul.f32 %v969_v61, %v3038_v60  ;;  %v968_v0 = vadd.f32 0.7978846, %v904_v48 }
 0x188   : > { %2299 = vtanh.f32 %v1028_v55  ;;  %v3130_v6 = vmul.f32 0.5, %v3033_v52  ;;  %v906_v34 = vmul.f32 0.035677407, %v778_v20  ;;  %v3133_v44 = vadd.f32 %v712_v23, %v2736_v37  ;;  %v3135_v9 = vpop.eup %2287  ;;  %v716_v20 = vpop.f32.mrf.mxu1 }
 0x189   : > { %2301 = vtanh.f32 %v1030_v43  ;;  %v3138_v3 = vmul.f32 0.5, %v3038_v60  ;;  %v907_v18 = vmul.f32 0.035677407, %v779_v63  ;;  %v780_v24 = vmul.f32 %v3113_v27, %v3113_v27  ;;  %v603_v60 = vpop.f32.mrf.mxu0 }
 0x18a   : > { %2303 = vtanh.f32 %v1031_v13  ;;  %v909_v41 = vmul.f32 0.035677407, %v781_v2  ;;  %v3143_v57 = vadd.f32 %v601_v14, %v2730_v32  ;;  %v3146_v52 = vadd.f32 %v714_v51, %v2732_v33 }
 0x18b   : > { %2305 = vtanh.f32 %v1033_v11  ;;  %v3148_v59 = vmul.f32 0.5, %v594_v53  ;;  %v1032_v26 = vmul.f32 %v968_v0, %v594_v53  ;;  %v3151_v8 = vmul.f32 0.5, %v3084_v22  ;;  %v607_v0 = vpop.f32.mrf.mxu0 }
 0x18c   : > { %v970_v38 = vadd.f32 0.7978846, %v906_v34  ;;  %v3154_v39 = vmul.f32 0.5, %v3087_v46  ;;  %v782_v61 = vmul.f32 %v3133_v44, %v3133_v44  ;;  %v1132_v48 = vadd.f32 1.0, %v2924_v50 }
 0x18d   : > { %v971_v58 = vadd.f32 0.7978846, %v907_v18  ;;  %v3160_v23 = vmul.f32 0.5, %v3113_v27  ;;  %v908_v55 = vmul.f32 0.035677407, %v780_v24  ;;  %v1136_v53 = vadd.f32 1.0, %v2987_v19 }
 0x18e   : > { %3600 = vst [vmem:[#allocation38_spill] sm:$0xff] %v3154_v39  ;;  %v973_v43 = vadd.f32 0.7978846, %v909_v41  ;;  %v783_v49 = vmul.f32 %v3143_v57, %v3143_v57  ;;  %v785_v63 = vmul.f32 %v3146_v52, %v3146_v52  ;;  %v1134_v13 = vadd.f32 1.0, %v2946_v35  ;;  %v720_v41 = vpop.f32.mrf.mxu1 }
 0x18f   : > { %2307 = vtanh.f32 %v1032_v26  ;;  %v1196_v50 = vmul.f32 %v1132_v48, %v2814_v10  ;;  %v1200_v2 = vmul.f32 %v1136_v53, %v2848_v30  ;;  %v1138_v11 = vadd.f32 1.0, %v2997_v29  ;;  %v3171_v14 = vpop.eup %2289 }
 0x190   : > { %v1034_v19 = vmul.f32 %v970_v38, %v3084_v22  ;;  %v910_v51 = vmul.f32 0.035677407, %v782_v61  ;;  %v3175_v34 = vadd.f32 %v603_v60, %v2734_v36  ;;  %v3178_v18 = vadd.f32 %v716_v20, %v2736_v37  ;;  %v3180_v35 = vpop.eup %2291  ;;  %v609_v20 = vpop.f32.mrf.mxu0 }
 0x191   : > { %v972_v24 = vadd.f32 0.7978846, %v908_v55  ;;  %v1256_v10 = vpack.c.bf16 %v1200_v2, %v1196_v50  ;;  %v1198_v30 = vmul.f32 %v1134_v13, %v2827_v21  ;;  %v1202_v29 = vmul.f32 %v1138_v11, %v2861_v62  ;;  %v3184_v26 = vpop.eup %2293 }
 0x192   : > { %v1035_v22 = vmul.f32 %v971_v58, %v3087_v46  ;;  %v911_v38 = vmul.f32 0.035677407, %v783_v49  ;;  %v913_v61 = vmul.f32 0.035677407, %v785_v63  ;;  %v784_v60 = vmul.f32 %v3175_v34, %v3175_v34 }
 0x193   : > { %v3189_v48 = vpop.eup %2295  ;;  %1586 = vmatprep.mubr.bf16.mxu0 %v1256_v10  ;;  %v1258_v53 = vpack.c.bf16 %v1202_v29, %v1198_v30  ;;  %v786_v55 = vmul.f32 %v3178_v18, %v3178_v18  ;;  %v1131_v21 = vadd.f32 1.0, %v2908_v40  ;;  %v1135_v62 = vadd.f32 1.0, %v2951_v4  ;;  %v722_v10 = vpop.f32.mrf.mxu1 }
 0x194   : > { %v3195_v13 = vpop.eup %2297  ;;  %v1037_v46 = vmul.f32 %v973_v43, %v3090_v45  ;;  %v974_v58 = vadd.f32 0.7978846, %v910_v51  ;;  %v1133_v49 = vadd.f32 1.0, %v2915_v47  ;;  %v1137_v63 = vadd.f32 1.0, %v2969_v1  ;;  %v3615_v45 = vld [vmem:[#allocation15_spill] sm:$0xff] }
 0x195   : > { %v3200_v50 = vpop.eup %2299  ;;  %1683 = vmatprep.mubr.bf16.mxu1 %v1258_v53  ;;  %v1195_v2 = vmul.f32 %v1131_v21, %v2810_v5  ;;  %v1199_v11 = vmul.f32 %v1135_v62, %v2830_v17  ;;  %v3205_v40 = vadd.f32 %v607_v0, %v2730_v32  ;;  %v3208_v4 = vadd.f32 %v720_v41, %v2732_v33  ;;  %v611_v21 = vpop.f32.mrf.mxu0 }
 0x196   : > { %v3210_v43 = vpop.eup %2301  ;;  %v975_v51 = vadd.f32 0.7978846, %v911_v38  ;;  %v912_v47 = vmul.f32 0.035677407, %v784_v60  ;;  %v1197_v1 = vmul.f32 %v1133_v49, %v2812_v7  ;;  %v1201_v30 = vmul.f32 %v1137_v63, %v2833_v25 }
 0x197   : > { %3601 = vst [vmem:[#allocation39_spill] sm:$0xff] %v3205_v40  ;;  %3602 = vst [vmem:[#allocation40_spill] sm:$0xff] %v3208_v4  ;;  %v3214_v29 = vpop.eup %2303  ;;  %v1036_v5 = vmul.f32 %v972_v24, %v3113_v27  ;;  %v977_v17 = vadd.f32 0.7978846, %v913_v61  ;;  %v914_v53 = vmul.f32 0.035677407, %v786_v55  ;;  %v1255_v0 = vpack.c.bf16 %v1199_v11, %v1195_v2  ;;  %v724_v61 = vpop.f32.mrf.mxu1 }
 0x198   : > { %v3217_v62 = vpop.eup %2305  ;;  %2309 = vtanh.f32 %v1034_v19  ;;  %v1257_v41 = vpack.c.bf16 %v1201_v30, %v1197_v1  ;;  %v787_v38 = vmul.f32 %v3205_v40, %v3205_v40  ;;  %v789_v7 = vmul.f32 %v3208_v4, %v3208_v4 }
 0x199   : > { %2311 = vtanh.f32 %v1035_v22  ;;  %v1038_v25 = vmul.f32 %v974_v58, %v3133_v44  ;;  %1587 = vmatmul.mubr.bf16.gmra.mxu0 %v1255_v0  ;;  %v3225_v27 = vadd.f32 %v609_v20, %v2734_v36  ;;  %v3228_v24 = vadd.f32 %v722_v10, %v2736_v37 }
 0x19a   : > { %2313 = vtanh.f32 %v1037_v46  ;;  %v1039_v19 = vmul.f32 %v975_v51, %v3143_v57  ;;  %v976_v60 = vadd.f32 0.7978846, %v912_v47  ;;  %1684 = vmatmul.mubr.bf16.gmra.mxu1 %v1257_v41  ;;  %v3232_v55 = vadd.f32 %v611_v21, %v2730_v32  ;;  %v3609_v47 = vld [vmem:[#allocation29_spill] sm:$0xff]  ;;  %v726_v41 = vpop.f32.mrf.mxu1 }
 0x19b   : > { %3603 = vst [vmem:[#allocation41_spill] sm:$0xff] %v3225_v27  ;;  %3604 = vst [vmem:[#allocation42_spill] sm:$0xff] %v3228_v24  ;;  %2315 = vtanh.f32 %v1036_v5  ;;  %v1041_v22 = vmul.f32 %v977_v17, %v3146_v52  ;;  %v978_v58 = vadd.f32 0.7978846, %v914_v53  ;;  %v788_v20 = vmul.f32 %v3225_v27, %v3225_v27  ;;  %v613_v53 = vpop.f32.mrf.mxu0 }
 0x19c   : > { %3605 = vst [vmem:[#allocation43_spill] sm:$0xff] %v3232_v55  ;;  %v3237_v49 = vpop.eup %2307  ;;  %v915_v63 = vmul.f32 0.035677407, %v787_v38  ;;  %v917_v2 = vmul.f32 0.035677407, %v789_v7  ;;  %v790_v46 = vmul.f32 %v3228_v24, %v3228_v24  ;;  %v3242_v11 = vadd.f32 %v724_v61, %v2732_v33  ;;  %v3611_v61 = vld [vmem:[#allocation14_spill] sm:$0xff] }
 0x19d   : > { %v3245_v10 = vmul.f32 0.5, %v3133_v44  ;;  %2317 = vtanh.f32 %v1038_v25  ;;  %v3248_v51 = vmul.f32 0.5, %v3143_v57  ;;  %v1140_v1 = vadd.f32 1.0, %v3609_v47  ;;  %v3613_v47 = vld [vmem:[#allocation31_spill] sm:$0xff] }
 0x19e   : > { %3606 = vst [vmem:[#allocation44_spill] sm:$0xff] %v3242_v11  ;;  %2319 = vtanh.f32 %v1039_v19  ;;  %v1040_v30 = vmul.f32 %v976_v60, %v3175_v34  ;;  %v916_v5 = vmul.f32 0.035677407, %v788_v20  ;;  %v791_v17 = vmul.f32 %v3232_v55, %v3232_v55  ;;  %v3612_v60 = vld [vmem:[#allocation18_spill] sm:$0xff] }
 0x19f   : > { %3607 = vst [vmem:[#allocation45_spill] sm:$0xff] %v3245_v10  ;;  %3608 = vst [vmem:[#allocation46_spill] sm:$0xff] %v3248_v51  ;;  %v3255_v0 = vmul.f32 0.5, %v3146_v52  ;;  %2321 = vtanh.f32 %v1041_v22  ;;  %v918_v44 = vmul.f32 0.035677407, %v790_v46  ;;  %v1144_v21 = vadd.f32 1.0, %v3071_v31 }
 0x1a0   : > { %v1042_v57 = vmul.f32 %v978_v58, %v3178_v18  ;;  %v979_v38 = vadd.f32 0.7978846, %v915_v63  ;;  %v981_v7 = vadd.f32 0.7978846, %v917_v2  ;;  %v793_v25 = vmul.f32 %v3242_v11, %v3242_v11  ;;  %v3614_v52 = vld [vmem:[#allocation35_spill] sm:$0xff]  ;;  %v617_v58 = vpop.f32.mrf.mxu0 }
 0x1a1   : > { %3610 = vst [vmem:[#allocation29_spill] sm:$0xff] %v3255_v0  ;;  %v1204_v19 = vmul.f32 %v1140_v1, %v3611_v61  ;;  %v1208_v20 = vmul.f32 %v1144_v21, %v3612_v60  ;;  %v1142_v39 = vadd.f32 1.0, %v3613_v47  ;;  %v1146_v0 = vadd.f32 1.0, %v3614_v52  ;;  %v3616_v10 = vld [vmem:[#allocation19_spill] sm:$0xff]  ;;  %v730_v1 = vpop.f32.mrf.mxu1 }
 0x1a2   : > { %2323 = vtanh.f32 %v1040_v30  ;;  %v980_v22 = vadd.f32 0.7978846, %v916_v5  ;;  %v919_v46 = vmul.f32 0.035677407, %v791_v17  ;;  %v3266_v31 = vadd.f32 %v613_v53, %v2734_v36 }
 0x1a3   : > { %v982_v63 = vadd.f32 0.7978846, %v918_v44  ;;  %v1260_v2 = vpack.c.bf16 %v1208_v20, %v1204_v19  ;;  %v1206_v51 = vmul.f32 %v1142_v39, %v3615_v45  ;;  %v1210_v54 = vmul.f32 %v1146_v0, %v3616_v10  ;;  %v3617_v45 = vld [vmem:[#allocation25_spill] sm:$0xff]  ;;  %v3620_v19 = vld [vmem:[#allocation26_spill] sm:$0xff]  ;;  %v619_v20 = vpop.f32.mrf.mxu0 }
 0x1a4   : > { %2325 = vtanh.f32 %v1042_v57  ;;  %v1043_v21 = vmul.f32 %v979_v38, %v3205_v40  ;;  %v921_v61 = vmul.f32 0.035677407, %v793_v25  ;;  %v792_v30 = vmul.f32 %v3266_v31, %v3266_v31  ;;  %v3619_v38 = vld [vmem:[#allocation32_spill] sm:$0xff] }
 0x1a5   : > { %v3273_v5 = vpop.eup %2309  ;;  %v1045_v17 = vmul.f32 %v981_v7, %v3208_v4  ;;  %1594 = vmatprep.mubr.bf16.mxu0 %v1260_v2  ;;  %v1262_v53 = vpack.c.bf16 %v1210_v54, %v1206_v51  ;;  %v3277_v44 = vadd.f32 %v726_v41, %v2736_v37  ;;  %v1139_v39 = vadd.f32 1.0, %v3617_v45  ;;  %v3622_v41 = vld [vmem:[#allocation34_spill] sm:$0xff]  ;;  %v732_v2 = vpop.f32.mrf.mxu1  ;;  %v3623_v45 = vld [vmem:[#allocation12_spill] sm:$0xff] }
 0x1a6   : > { %v3280_v10 = vpop.eup %2311  ;;  %v983_v0 = vadd.f32 0.7978846, %v919_v46  ;;  %v920_v57 = vmul.f32 0.035677407, %v792_v30  ;;  %v1143_v25 = vadd.f32 1.0, %v3619_v38  ;;  %v1141_v60 = vadd.f32 1.0, %v3620_v19 }
 0x1a7   : > { %3618 = vst [vmem:[#allocation14_spill] sm:$0xff] %v3280_v10  ;;  %v3284_v47 = vpop.eup %2313  ;;  %v1044_v7 = vmul.f32 %v980_v22, %v3225_v27  ;;  %v1046_v54 = vmul.f32 %v982_v63, %v3228_v24  ;;  %1691 = vmatprep.mubr.bf16.mxu1 %v1262_v53  ;;  %v794_v51 = vmul.f32 %v3277_v44, %v3277_v44  ;;  %v1145_v52 = vadd.f32 1.0, %v3622_v41  ;;  %v3624_v19 = vld [vmem:[#allocation16_spill] sm:$0xff]  ;;  %v3625_v27 = vld [vmem:[#allocation13_spill] sm:$0xff] }
 0x1a8   : > { %3621 = vst [vmem:[#allocation18_spill] sm:$0xff] %v3284_v47  ;;  %v3291_v46 = vpop.eup %2315  ;;  %v985_v30 = vadd.f32 0.7978846, %v921_v61  ;;  %v1203_v38 = vmul.f32 %v1139_v39, %v3623_v45  ;;  %v1207_v4 = vmul.f32 %v1143_v25, %v3624_v19  ;;  %v3296_v40 = vadd.f32 %v617_v58, %v2730_v32  ;;  %v3626_v53 = vld [vmem:[#allocation17_spill] sm:$0xff]  ;;  %v621_v25 = vpop.f32.mrf.mxu0 }
 0x1a9   : > { %v984_v22 = vadd.f32 0.7978846, %v920_v57  ;;  %v1205_v63 = vmul.f32 %v1141_v60, %v3625_v27  ;;  %v1209_v24 = vmul.f32 %v1145_v52, %v3626_v53  ;;  %v3301_v47 = vadd.f32 %v619_v20, %v2734_v36  ;;  %v734_v60 = vpop.f32.mrf.mxu1 }
 0x1aa   : > { %v3303_v41 = vpop.eup %2317  ;;  %2327 = vtanh.f32 %v1043_v21  ;;  %v922_v10 = vmul.f32 0.035677407, %v794_v51  ;;  %v1259_v61 = vpack.c.bf16 %v1207_v4, %v1203_v38  ;;  %v3306_v39 = vadd.f32 %v730_v1, %v2732_v33 }
 0x1ab   : > { %v3308_v45 = vpop.eup %2319  ;;  %2329 = vtanh.f32 %v1045_v17  ;;  %v1047_v58 = vmul.f32 %v983_v0, %v3232_v55  ;;  %v1261_v27 = vpack.c.bf16 %v1209_v24, %v1205_v63  ;;  %v795_v57 = vmul.f32 %v3296_v40, %v3296_v40 }
 0x1ac   : > { %v3313_v20 = vpop.eup %2321  ;;  %v3316_v21 = vmul.f32 0.5, %v3175_v34  ;;  %2331 = vtanh.f32 %v1044_v7  ;;  %v1049_v4 = vmul.f32 %v985_v30, %v3242_v11  ;;  %1595 = vmatmul.mubr.bf16.gmra.mxu0 %v1259_v61  ;;  %v796_v1 = vmul.f32 %v3301_v47, %v3301_v47 }
 0x1ad   : > { %2333 = vtanh.f32 %v1046_v54  ;;  %v1048_v17 = vmul.f32 %v984_v22, %v3266_v31  ;;  %1692 = vmatmul.mubr.bf16.gmra.mxu1 %v1261_v27  ;;  %v3323_v24 = vadd.f32 %v732_v2, %v2736_v37  ;;  %v3326_v0 = vadd.f32 %v621_v25, %v2730_v32  ;;  %v623_v27 = vpop.f32.mrf.mxu0 }
 0x1ae   : > { %v986_v51 = vadd.f32 0.7978846, %v922_v10  ;;  %v797_v34 = vmul.f32 %v3306_v39, %v3306_v39  ;;  %v924_v7 = vmul.f32 0.035677407, %v796_v1  ;;  %v3331_v52 = vadd.f32 %v734_v60, %v2732_v33  ;;  %v736_v1 = vpop.f32.mrf.mxu1 }
 0x1af   : > { %v3333_v30 = vpop.eup %2323  ;;  %v3336_v54 = vmul.f32 0.5, %v3178_v18  ;;  %2335 = vtanh.f32 %v1047_v58  ;;  %v923_v38 = vmul.f32 0.035677407, %v795_v57  ;;  %v798_v2 = vmul.f32 %v3323_v24, %v3323_v24 }
 0x1b0   : > { %2337 = vtanh.f32 %v1049_v4  ;;  %v988_v32 = vadd.f32 0.7978846, %v924_v7  ;;  %v799_v10 = vmul.f32 %v3326_v0, %v3326_v0  ;;  %v1148_v19 = vadd.f32 1.0, %v3115_v15  ;;  %v3627_v7 = vld [vmem:[#allocation22_spill] sm:$0xff] }
 0x1b1   : > { %v3343_v22 = vpop.eup %2325  ;;  %v3346_v33 = vmul.f32 0.5, %v3266_v31  ;;  %2339 = vtanh.f32 %v1048_v17  ;;  %v926_v18 = vmul.f32 0.035677407, %v798_v2  ;;  %v801_v63 = vmul.f32 %v3331_v52, %v3331_v52  ;;  %v3628_v2 = vld [vmem:[#allocation28_spill] sm:$0xff] }
 0x1b2   : > { %v1050_v53 = vmul.f32 %v986_v51, %v3277_v44  ;;  %v925_v61 = vmul.f32 0.035677407, %v797_v34  ;;  %v927_v25 = vmul.f32 0.035677407, %v799_v10  ;;  %v1152_v58 = vadd.f32 1.0, %v3180_v35 }
 0x1b3   : > { %v987_v57 = vadd.f32 0.7978846, %v923_v38  ;;  %v1052_v15 = vmul.f32 %v988_v32, %v3301_v47  ;;  %v990_v60 = vadd.f32 0.7978846, %v926_v18  ;;  %v929_v4 = vmul.f32 0.035677407, %v801_v63 }
 0x1b4   : > { %v991_v31 = vadd.f32 0.7978846, %v927_v25  ;;  %v1212_v17 = vmul.f32 %v1148_v19, %v3627_v7  ;;  %v1216_v11 = vmul.f32 %v1152_v58, %v3628_v2  ;;  %v1150_v55 = vadd.f32 1.0, %v3123_v12  ;;  %v3629_v63 = vld [vmem:[#allocation23_spill] sm:$0xff]  ;;  %v3630_v25 = vld [vmem:[#allocation30_spill] sm:$0xff]  ;;  %v3631_v2 = vld [vmem:[#allocation20_spill] sm:$0xff] }
 0x1b5   : > { %v1054_v51 = vmul.f32 %v990_v60, %v3323_v24  ;;  %v993_v34 = vadd.f32 0.7978846, %v929_v4  ;;  %v1154_v10 = vadd.f32 1.0, %v3184_v26  ;;  %v3359_v35 = vadd.f32 %v623_v27, %v2734_v36 }
 0x1b6   : > { %2341 = vtanh.f32 %v1050_v53  ;;  %v3361_v38 = vadd.f32 0.7978846, %v925_v61  ;;  %v1264_v32 = vpack.c.bf16 %v1216_v11, %v1212_v17  ;;  %v3364_v18 = vadd.f32 %v736_v1, %v2736_v37 }
 0x1b7   : > { %v3366_v19 = vpop.eup %2327  ;;  %2343 = vtanh.f32 %v1052_v15  ;;  %v1214_v12 = vmul.f32 %v1150_v55, %v3629_v63  ;;  %v1218_v58 = vmul.f32 %v1154_v10, %v3630_v25  ;;  %v800_v26 = vmul.f32 %v3359_v35, %v3359_v35  ;;  %v3632_v63 = vld [vmem:[#allocation24_spill] sm:$0xff]  ;;  %v3633_v25 = vld [vmem:[#allocation21_spill] sm:$0xff] }
 0x1b8   : > { %v3372_v60 = vpop.eup %2329  ;;  %v1051_v36 = vmul.f32 %v987_v57, %v3296_v40  ;;  %2345 = vtanh.f32 %v1054_v51  ;;  %v1055_v11 = vmul.f32 %v991_v31, %v3326_v0  ;;  %1602 = vmatprep.mubr.bf16.mxu0 %v1264_v32  ;;  %v802_v37 = vmul.f32 %v3364_v18, %v3364_v18 }
 0x1b9   : > { %v3378_v53 = vpop.eup %2331  ;;  %v1057_v55 = vmul.f32 %v993_v34, %v3331_v52  ;;  %v1266_v61 = vpack.c.bf16 %v1218_v58, %v1214_v12  ;;  %v928_v27 = vmul.f32 0.035677407, %v800_v26  ;;  %v1147_v15 = vadd.f32 1.0, %v3096_v16 }
 0x1ba   : > { %v3382_v4 = vpop.eup %2333  ;;  %v930_v1 = vmul.f32 0.035677407, %v802_v37  ;;  %v1151_v57 = vadd.f32 1.0, %v3135_v9  ;;  %v1149_v7 = vadd.f32 1.0, %v3104_v42  ;;  %v1153_v31 = vadd.f32 1.0, %v3171_v14  ;;  %v3634_v9 = vld [vmem:[#allocation27_spill] sm:$0xff] }
 0x1bb   : > { %1699 = vmatprep.mubr.bf16.mxu1 %v1266_v61  ;;  %v992_v17 = vadd.f32 0.7978846, %v928_v27  ;;  %v1211_v51 = vmul.f32 %v1147_v15, %v3631_v2  ;;  %v1156_v10 = vadd.f32 1.0, %v3200_v50  ;;  %v1160_v34 = vadd.f32 1.0, %v3237_v49 }
 0x1bc   : > { %v3390_v32 = vpop.eup %2335  ;;  %v994_v16 = vadd.f32 0.7978846, %v930_v1  ;;  %v1215_v12 = vmul.f32 %v1151_v57, %v3632_v63  ;;  %v1213_v58 = vmul.f32 %v1149_v7, %v3633_v25  ;;  %v1217_v26 = vmul.f32 %v1153_v31, %v3634_v9 }
 0x1bd   : > { %v3395_v42 = vpop.eup %2337  ;;  %v1056_v14 = vmul.f32 %v992_v17, %v3359_v35  ;;  %v1220_v37 = vmul.f32 %v1156_v10, %v3118_v28  ;;  %v1224_v61 = vmul.f32 %v1160_v34, %v3148_v59  ;;  %v1158_v50 = vadd.f32 1.0, %v3210_v43 }
 0x1be   : > { %v2340_v49 = vpop.eup %2339  ;;  %v1058_v27 = vmul.f32 %v994_v16, %v3364_v18  ;;  %v1263_v15 = vpack.c.bf16 %v1215_v12, %v1211_v51  ;;  %v1265_v1 = vpack.c.bf16 %v1217_v26, %v1213_v58  ;;  %v1162_v57 = vadd.f32 1.0, %v3273_v5  ;;  %v3637_v12 = vld [vmem:[#allocation45_spill] sm:$0xff]  ;;  %v3638_v58 = vld [vmem:[#allocation14_spill] sm:$0xff] }
 0x1bf   : > { %2347 = vtanh.f32 %v1056_v14  ;;  %v1268_v7 = vpack.c.bf16 %v1224_v61, %v1220_v37  ;;  %v1222_v31 = vmul.f32 %v1158_v50, %v3126_v56  ;;  %v1155_v2 = vadd.f32 1.0, %v3189_v48 }
 0x1c0   : > { %2349 = vtanh.f32 %v1058_v27  ;;  %1603 = vmatmul.mubr.bf16.gmra.mxu0 %v1263_v15  ;;  %1700 = vmatmul.mubr.bf16.gmra.mxu1 %v1265_v1  ;;  %v1226_v28 = vmul.f32 %v1162_v57, %v3151_v8  ;;  %v1159_v59 = vadd.f32 1.0, %v3214_v29  ;;  %v1157_v43 = vadd.f32 1.0, %v3195_v13  ;;  %v3640_v27 = vld [vmem:[#allocation41_spill] sm:$0xff]  ;;  %v3641_v1 = vld [vmem:[#allocation42_spill] sm:$0xff] }
 0x1c1   : > { %2351 = vtanh.f32 %v1051_v36  ;;  %1610 = vmatprep.mubr.bf16.mxu0 %v1268_v7  ;;  %v1161_v17 = vadd.f32 1.0, %v3217_v62  ;;  %v1164_v5 = vadd.f32 1.0, %v3291_v46  ;;  %v1168_v51 = vadd.f32 1.0, %v3333_v30  ;;  %v3635_v30 = vld [vmem:[#allocation33_spill] sm:$0xff] }
 0x1c2   : > { %2353 = vtanh.f32 %v1055_v11  ;;  %v1270_v56 = vpack.c.bf16 %v1226_v28, %v1222_v31  ;;  %v1223_v48 = vmul.f32 %v1159_v59, %v3130_v6  ;;  %v1166_v10 = vadd.f32 1.0, %v3303_v41  ;;  %v3636_v6 = vld [vmem:[#allocation37_spill] sm:$0xff]  ;;  %v3645_v28 = vld [vmem:[#allocation38_spill] sm:$0xff] }
 0x1c3   : > { %v2342_v34 = vpop.eup %2341  ;;  %v1225_v8 = vmul.f32 %v1161_v17, %v3138_v3  ;;  %v1228_v29 = vmul.f32 %v1164_v5, %v3160_v23  ;;  %v1232_v13 = vmul.f32 %v1168_v51, %v3316_v21  ;;  %v1170_v36 = vadd.f32 1.0, %v3343_v22  ;;  %v3644_v31 = vld [vmem:[#allocation29_spill] sm:$0xff] }
 0x1c4   : > { %v2344_v62 = vpop.eup %2343  ;;  %v1053_v46 = vmul.f32 %v3361_v38, %v3306_v39  ;;  %2355 = vtanh.f32 %v1057_v55  ;;  %1707 = vmatprep.mubr.bf16.mxu1 %v1270_v56  ;;  %v1219_v11 = vmul.f32 %v1155_v2, %v3635_v30  ;;  %v1221_v16 = vmul.f32 %v1157_v43, %v3636_v6 }
 0x1c5   : > { %v2346_v41 = vpop.eup %2345  ;;  %v1272_v63 = vpack.c.bf16 %v1232_v13, %v1228_v29  ;;  %v1230_v3 = vmul.f32 %v1166_v10, %v3637_v12  ;;  %v1234_v23 = vmul.f32 %v1170_v36, %v3336_v54  ;;  %v1167_v21 = vadd.f32 1.0, %v3308_v45  ;;  %v3639_v54 = vld [vmem:[#allocation18_spill] sm:$0xff]  ;;  %v3646_v12 = vld [vmem:[#allocation43_spill] sm:$0xff] }
 0x1c6   : > { %v1267_v25 = vpack.c.bf16 %v1223_v48, %v1219_v11  ;;  %v1269_v22 = vpack.c.bf16 %v1225_v8, %v1221_v16  ;;  %v1163_v9 = vadd.f32 1.0, %v3638_v58  ;;  %v1169_v38 = vadd.f32 1.0, %v3313_v20  ;;  %v3642_v20 = vld [vmem:[#allocation46_spill] sm:$0xff] }
 0x1c7   : > { %v1274_v55 = vpack.c.bf16 %v1234_v23, %v1230_v3  ;;  %v1172_v26 = vadd.f32 1.0, %v3378_v53  ;;  %v1176_v14 = vadd.f32 1.0, %v2340_v49  ;;  %v1174_v37 = vadd.f32 1.0, %v3382_v4  ;;  %v3643_v49 = vld [vmem:[#allocation36_spill] sm:$0xff] }
 0x1c8   : > { %v858_v61 = vmul.f32 0.5, %v3277_v44  ;;  %2357 = vtanh.f32 %v1053_v46  ;;  %1611 = vmatmul.mubr.bf16.gmra.mxu0 %v1267_v25  ;;  %1708 = vmatmul.mubr.bf16.gmra.mxu1 %v1269_v22  ;;  %v1165_v50 = vadd.f32 1.0, %v3639_v54  ;;  %v1178_v45 = vadd.f32 1.0, %v2342_v34  ;;  %v3647_v23 = vld [vmem:[#allocation44_spill] sm:$0xff] }
 0x1c9   : > { %v852_v15 = vmul.f32 0.5, %v3640_v27  ;;  %v854_v57 = vmul.f32 0.5, %v3641_v1  ;;  %1618 = vmatprep.mubr.bf16.mxu0 %v1272_v63  ;;  %1715 = vmatprep.mubr.bf16.mxu1 %v1274_v55  ;;  %v1231_v7 = vmul.f32 %v1167_v21, %v3642_v20  ;;  %v1240_v53 = vmul.f32 %v1176_v14, %v3346_v33 }
 0x1ca   : > { %v845_v4 = vmul.f32 0.5, %v3643_v49  ;;  %v1233_v44 = vmul.f32 %v1169_v38, %v3644_v31  ;;  %v1242_v2 = vmul.f32 %v1178_v45, %v858_v61  ;;  %v1227_v59 = vmul.f32 %v1163_v9, %v3645_v28  ;;  %v3649_v9 = vld [vmem:[#allocation40_spill] sm:$0xff] }
 0x1cb   : > { %v1236_v43 = vmul.f32 %v1172_v26, %v852_v15  ;;  %v1238_v17 = vmul.f32 %v1174_v37, %v854_v57  ;;  %v1175_v33 = vadd.f32 1.0, %v3390_v32  ;;  %v1177_v36 = vadd.f32 1.0, %v3395_v42 }
 0x1cc   : > { %v2348_v5 = vpop.eup %2347  ;;  %v1229_v51 = vmul.f32 %v1165_v50, %v845_v4  ;;  %v1271_v48 = vpack.c.bf16 %v1231_v7, %v1227_v59  ;;  %v864_v11 = vmul.f32 0.5, %v3359_v35  ;;  %v866_v6 = vmul.f32 0.5, %v3364_v18  ;;  %v3456_v59 = vld [vmem:[%s3548_s4] ss:$0 sm:$0xff] }
 0x1cd   : > { %v2350_v56 = vpop.eup %2349  ;;  %v1276_v10 = vpack.c.bf16 %v1240_v53, %v1236_v43  ;;  %v1278_v34 = vpack.c.bf16 %v1242_v2, %v1238_v17  ;;  %v1184_v8 = vadd.f32 1.0, %v2348_v5  ;;  %v1180_v16 = vadd.f32 1.0, %v2344_v62  ;;  %v3648_v62 = vld [vmem:[#allocation39_spill] sm:$0xff] }
 0x1ce   : > { %v2352_v29 = vpop.eup %2351  ;;  %v1273_v13 = vpack.c.bf16 %v1233_v44, %v1229_v51  ;;  %v1186_v46 = vadd.f32 1.0, %v2350_v56  ;;  %v1182_v63 = vadd.f32 1.0, %v2346_v41  ;;  %v855_v3 = vmul.f32 0.5, %v3646_v12 }
 0x1cf   : > { %v2354_v30 = vpop.eup %2353  ;;  %v857_v21 = vmul.f32 0.5, %v3647_v23  ;;  %v1171_v25 = vadd.f32 1.0, %v3366_v19  ;;  %v1173_v32 = vadd.f32 1.0, %v3372_v60  ;;  %v860_v42 = vmul.f32 0.5, %v3301_v47 }
 0x1d0   : > { %1619 = vmatmul.mubr.bf16.gmra.mxu0 %v1271_v48  ;;  %1716 = vmatmul.mubr.bf16.gmra.mxu1 %v1273_v13  ;;  %v862_v58 = vmul.f32 0.5, %v3323_v24  ;;  %v1248_v35 = vmul.f32 %v1184_v8, %v864_v11  ;;  %v1250_v18 = vmul.f32 %v1186_v46, %v866_v6  ;;  %v851_v41 = vmul.f32 0.5, %v3648_v62 }
 0x1d1   : > { %v2356_v22 = vpop.eup %2355  ;;  %1626 = vmatprep.mubr.bf16.mxu0 %v1276_v10  ;;  %1723 = vmatprep.mubr.bf16.mxu1 %v1278_v34  ;;  %v853_v38 = vmul.f32 0.5, %v3649_v9  ;;  %v1239_v55 = vmul.f32 %v1175_v33, %v855_v3  ;;  %v1241_v26 = vmul.f32 %v1177_v36, %v857_v21  ;;  %v1244_v14 = vmul.f32 %v1180_v16, %v860_v42 }
 0x1d2   : > { %v1246_v37 = vmul.f32 %v1182_v63, %v862_v58  ;;  %v1235_v19 = vmul.f32 %v1171_v25, %v851_v41  ;;  %v1183_v24 = vadd.f32 1.0, %v2354_v30  ;;  %v1185_v27 = vadd.f32 1.0, %v2356_v22 }
 0x1d3   : > { %v1237_v61 = vmul.f32 %v1173_v32, %v853_v38  ;;  %v1280_v54 = vpack.c.bf16 %v1248_v35, %v1244_v14  ;;  %v863_v15 = vmul.f32 0.5, %v3326_v0  ;;  %v865_v1 = vmul.f32 0.5, %v3331_v52 }
 0x1d4   : > { %v1282_v50 = vpack.c.bf16 %v1250_v18, %v1246_v37  ;;  %v1275_v47 = vpack.c.bf16 %v1239_v55, %v1235_v19  ;;  %v1179_v57 = vadd.f32 1.0, %v2352_v29  ;;  %v859_v7 = vmul.f32 0.5, %v3296_v40 }
 0x1d5   : > { %v2358_v60 = vpop.eup %2357  ;;  %v1277_v45 = vpack.c.bf16 %v1241_v26, %v1237_v61  ;;  %v861_v53 = vmul.f32 0.5, %v3306_v39  ;;  %v1247_v49 = vmul.f32 %v1183_v24, %v863_v15  ;;  %v1249_v4 = vmul.f32 %v1185_v27, %v865_v1 }
 0x1d6   : > { %v1181_v20 = vadd.f32 1.0, %v2358_v60  ;;  %v1243_v31 = vmul.f32 %v1179_v57, %v859_v7 }
 0x1d8   : > { %1627 = vmatmul.mubr.bf16.gmra.mxu0 %v1275_v47  ;;  %1724 = vmatmul.mubr.bf16.gmra.mxu1 %v1277_v45  ;;  %v1245_v44 = vmul.f32 %v1181_v20, %v861_v53  ;;  %v1279_v2 = vpack.c.bf16 %v1247_v49, %v1243_v31 }
 0x1d9   : > { %1634 = vmatprep.mubr.bf16.mxu0 %v1280_v54  ;;  %1731 = vmatprep.mubr.bf16.mxu1 %v1282_v50 }
 0x1da   : > { %v1281_v28 = vpack.c.bf16 %v1249_v4, %v1245_v44 }
 0x1e0   : > { %1635 = vmatmul.mubr.bf16.gmra.mxu0 %v1279_v2  ;;  %1732 = vmatmul.mubr.bf16.gmra.mxu1 %v1281_v28 }
 0x245   : > { %v1963_v0 = vpop.f32.mrf.mxu0 }
 0x247   : > { %v2027_v52 = vpop.f32.mrf.mxu1  ;;  %v1964_v43 = vpop.f32.mrf.mxu0 }
 0x248   : > { %v1965_v40 = vadd.f32 %v1964_v43, %v1963_v0 }
 0x249   : > { %v2028_v17 = vpop.f32.mrf.mxu1  ;;  %v1966_v39 = vpop.f32.mrf.mxu0 }
 0x24a   : > { %v1581_v5 = vadd.f32 %v1965_v40, %v3456_v59  ;;  %v2029_v51 = vadd.f32 %v2028_v17, %v2027_v52 }
 0x24b   : > { %v2030_v56 = vpop.f32.mrf.mxu1  ;;  %v1967_v48 = vpop.f32.mrf.mxu0 }
 0x24c   : > { %v1678_v10 = vadd.f32 %v2029_v51, %v1581_v5  ;;  %v1968_v34 = vadd.f32 %v1967_v48, %v1966_v39 }
 0x24d   : > { %v2031_v8 = vpop.f32.mrf.mxu1 }
 0x24e   : > { %1740 = vst [vmem:[%s3461_s13] sm:$0xff] %v1678_v10  ;;  %v1584_v29 = vadd.f32 %v1968_v34, %v3456_v59  ;;  %v2032_v13 = vadd.f32 %v2031_v8, %v2030_v56 }
 0x250   : > { %v1681_v33 = vadd.f32 %v2032_v13, %v1584_v29 }
 0x252   : > { %1741 = vst [vmem:[%s3461_s13 + $0x8] sm:$0xff] %v1681_v33 }
 0x259   : > { %v1969_v36 = vpop.f32.mrf.mxu0 }
 0x25a   : > { %v2033_v46 = vpop.f32.mrf.mxu1 }
 0x25b   : > { %v1970_v30 = vpop.f32.mrf.mxu0 }
 0x25c   : > { %v1971_v11 = vadd.f32 %v1970_v30, %v1969_v36  ;;  %v2034_v6 = vpop.f32.mrf.mxu1 }
 0x25d   : > { %v1972_v16 = vpop.f32.mrf.mxu0  ;;  %v2035_v12 = vadd.f32 %v2034_v6, %v2033_v46 }
 0x25e   : > { %v1589_v63 = vadd.f32 %v1971_v11, %v3456_v59  ;;  %v2036_v3 = vpop.f32.mrf.mxu1 }
 0x25f   : > { %v1973_v23 = vpop.f32.mrf.mxu0 }
 0x260   : > { %v1686_v21 = vadd.f32 %v2035_v12, %v1589_v63  ;;  %v1974_v25 = vadd.f32 %v1973_v23, %v1972_v16  ;;  %v2037_v32 = vpop.f32.mrf.mxu1 }
 0x261   : > { %v2038_v42 = vadd.f32 %v2037_v32, %v2036_v3 }
 0x262   : > { %1742 = vst [vmem:[%s3461_s13 + $0x10] sm:$0xff] %v1686_v21  ;;  %v1592_v22 = vadd.f32 %v1974_v25, %v3456_v59 }
 0x264   : > { %v1689_v58 = vadd.f32 %v2038_v42, %v1592_v22 }
 0x266   : > { %1743 = vst [vmem:[%s3461_s13 + $0x18] sm:$0xff] %v1689_v58 }
 0x26c   : > { %v1975_v35 = vpop.f32.mrf.mxu0 }
 0x26d   : > { %v2039_v18 = vpop.f32.mrf.mxu1 }
 0x26e   : > { %v1976_v62 = vpop.f32.mrf.mxu0 }
 0x26f   : > { %v1977_v41 = vadd.f32 %v1976_v62, %v1975_v35  ;;  %v2040_v9 = vpop.f32.mrf.mxu1 }
 0x270   : > { %v1978_v38 = vpop.f32.mrf.mxu0  ;;  %v2041_v26 = vadd.f32 %v2040_v9, %v2039_v18 }
 0x271   : > { %v1597_v55 = vadd.f32 %v1977_v41, %v3456_v59  ;;  %v2042_v14 = vpop.f32.mrf.mxu1 }
 0x272   : > { %v1979_v37 = vpop.f32.mrf.mxu0 }
 0x273   : > { %v1694_v19 = vadd.f32 %v2041_v26, %v1597_v55  ;;  %v1980_v61 = vadd.f32 %v1979_v37, %v1978_v38  ;;  %v2043_v60 = vpop.f32.mrf.mxu1 }
 0x274   : > { %v2044_v50 = vadd.f32 %v2043_v60, %v2042_v14 }
 0x275   : > { %1744 = vst [vmem:[%s3461_s13 + $0x20] sm:$0xff] %v1694_v19  ;;  %v1600_v54 = vadd.f32 %v1980_v61, %v3456_v59 }
 0x277   : > { %v1697_v47 = vadd.f32 %v2044_v50, %v1600_v54 }
 0x279   : > { %1745 = vst [vmem:[%s3461_s13 + $0x28] sm:$0xff] %v1697_v47 }
 0x280   : > { %v1981_v45 = vpop.f32.mrf.mxu0  ;;  %v2045_v24 = vpop.f32.mrf.mxu1 }
 0x282   : > { %v1982_v27 = vpop.f32.mrf.mxu0  ;;  %v2046_v15 = vpop.f32.mrf.mxu1 }
 0x283   : > { %v1983_v1 = vadd.f32 %v1982_v27, %v1981_v45  ;;  %v2047_v53 = vadd.f32 %v2046_v15, %v2045_v24 }
 0x284   : > { %v1984_v57 = vpop.f32.mrf.mxu0  ;;  %v2048_v20 = vpop.f32.mrf.mxu1 }
 0x285   : > { %v1605_v7 = vadd.f32 %v1983_v1, %v3456_v59 }
 0x286   : > { %v1985_v49 = vpop.f32.mrf.mxu0  ;;  %v2049_v4 = vpop.f32.mrf.mxu1 }
 0x287   : > { %v1702_v31 = vadd.f32 %v2047_v53, %v1605_v7  ;;  %v1986_v44 = vadd.f32 %v1985_v49, %v1984_v57  ;;  %v2050_v52 = vadd.f32 %v2049_v4, %v2048_v20 }
 0x288   : > { %v1987_v2 = vpop.f32.mrf.mxu0  ;;  %v2051_v28 = vpop.f32.mrf.mxu1 }
 0x289   : > { %1746 = vst [vmem:[%s3461_s13 + $0x30] sm:$0xff] %v1702_v31  ;;  %v1608_v0 = vadd.f32 %v1986_v44, %v3456_v59 }
 0x28a   : > { %v1988_v43 = vpop.f32.mrf.mxu0  ;;  %v2052_v40 = vpop.f32.mrf.mxu1 }
 0x28b   : > { %v1705_v17 = vadd.f32 %v2050_v52, %v1608_v0  ;;  %v1989_v39 = vadd.f32 %v1988_v43, %v1987_v2  ;;  %v2053_v48 = vadd.f32 %v2052_v40, %v2051_v28 }
 0x28c   : > { %v1990_v5 = vpop.f32.mrf.mxu0  ;;  %v2054_v51 = vpop.f32.mrf.mxu1 }
 0x28d   : > { %1747 = vst [vmem:[%s3461_s13 + $0x38] sm:$0xff] %v1705_v17  ;;  %v1613_v56 = vadd.f32 %v1989_v39, %v3456_v59 }
 0x28e   : > { %v1991_v10 = vpop.f32.mrf.mxu0  ;;  %v2055_v34 = vpop.f32.mrf.mxu1 }
 0x28f   : > { %v1710_v8 = vadd.f32 %v2053_v48, %v1613_v56  ;;  %v1992_v29 = vadd.f32 %v1991_v10, %v1990_v5  ;;  %v2056_v46 = vadd.f32 %v2055_v34, %v2054_v51 }
 0x290   : > { %v1993_v13 = vpop.f32.mrf.mxu0  ;;  %v2057_v33 = vpop.f32.mrf.mxu1 }
 0x291   : > { %1748 = vst [vmem:[%s3461_s13 + $0x40] sm:$0xff] %v1710_v8  ;;  %v1616_v36 = vadd.f32 %v1992_v29, %v3456_v59 }
 0x292   : > { %v1994_v30 = vpop.f32.mrf.mxu0  ;;  %v2058_v11 = vpop.f32.mrf.mxu1 }
 0x293   : > { %v1713_v6 = vadd.f32 %v2056_v46, %v1616_v36  ;;  %v1995_v16 = vadd.f32 %v1994_v30, %v1993_v13  ;;  %v2059_v23 = vadd.f32 %v2058_v11, %v2057_v33 }
 0x294   : > { %v1996_v63 = vpop.f32.mrf.mxu0  ;;  %v2060_v12 = vpop.f32.mrf.mxu1 }
 0x295   : > { %1749 = vst [vmem:[%s3461_s13 + $0x48] sm:$0xff] %v1713_v6  ;;  %v1621_v3 = vadd.f32 %v1995_v16, %v3456_v59 }
 0x296   : > { %v1997_v21 = vpop.f32.mrf.mxu0  ;;  %v2061_v25 = vpop.f32.mrf.mxu1 }
 0x297   : > { %v1718_v32 = vadd.f32 %v2059_v23, %v1621_v3  ;;  %v1998_v22 = vadd.f32 %v1997_v21, %v1996_v63  ;;  %v2062_v18 = vadd.f32 %v2061_v25, %v2060_v12 }
 0x298   : > { %v1999_v42 = vpop.f32.mrf.mxu0  ;;  %v2063_v58 = vpop.f32.mrf.mxu1 }
 0x299   : > { %1750 = vst [vmem:[%s3461_s13 + $0x50] sm:$0xff] %v1718_v32  ;;  %v1624_v35 = vadd.f32 %v1998_v22, %v3456_v59 }
 0x29a   : > { %v2000_v62 = vpop.f32.mrf.mxu0  ;;  %v2064_v41 = vpop.f32.mrf.mxu1 }
 0x29b   : > { %v1721_v9 = vadd.f32 %v2062_v18, %v1624_v35  ;;  %v2001_v38 = vadd.f32 %v2000_v62, %v1999_v42  ;;  %v2065_v37 = vadd.f32 %v2064_v41, %v2063_v58 }
 0x29c   : > { %v2002_v55 = vpop.f32.mrf.mxu0  ;;  %v2066_v26 = vpop.f32.mrf.mxu1 }
 0x29d   : > { %1751 = vst [vmem:[%s3461_s13 + $0x58] sm:$0xff] %v1721_v9  ;;  %v1629_v14 = vadd.f32 %v2001_v38, %v3456_v59 }
 0x29e   : > { %v2003_v19 = vpop.f32.mrf.mxu0  ;;  %v2067_v61 = vpop.f32.mrf.mxu1 }
 0x29f   : > { %v1726_v60 = vadd.f32 %v2065_v37, %v1629_v14  ;;  %v2004_v54 = vadd.f32 %v2003_v19, %v2002_v55  ;;  %v2068_v24 = vadd.f32 %v2067_v61, %v2066_v26 }
 0x2a0   : > { %v2005_v50 = vpop.f32.mrf.mxu0  ;;  %v2069_v47 = vpop.f32.mrf.mxu1 }
 0x2a1   : > { %1752 = vst [vmem:[%s3461_s13 + $0x60] sm:$0xff] %v1726_v60  ;;  %v1632_v45 = vadd.f32 %v2004_v54, %v3456_v59 }
 0x2a2   : > { %v2006_v27 = vpop.f32.mrf.mxu0  ;;  %v2070_v15 = vpop.f32.mrf.mxu1 }
 0x2a3   : > { %v1729_v1 = vadd.f32 %v2068_v24, %v1632_v45  ;;  %v2007_v57 = vadd.f32 %v2006_v27, %v2005_v50  ;;  %v2071_v49 = vadd.f32 %v2070_v15, %v2069_v47 }
 0x2a4   : > { %v2008_v20 = vpop.f32.mrf.mxu0  ;;  %v2072_v7 = vpop.f32.mrf.mxu1 }
 0x2a5   : > { %1753 = vst [vmem:[%s3461_s13 + $0x68] sm:$0xff] %v1729_v1  ;;  %v1637_v53 = vadd.f32 %v2007_v57, %v3456_v59 }
 0x2a6   : > { %v2009_v4 = vpop.f32.mrf.mxu0  ;;  %v2073_v31 = vpop.f32.mrf.mxu1 }
 0x2a7   : > { %v1734_v44 = vadd.f32 %v2071_v49, %v1637_v53  ;;  %v2010_v2 = vadd.f32 %v2009_v4, %v2008_v20  ;;  %v2074_v0 = vadd.f32 %v2073_v31, %v2072_v7 }
 0x2a9   : > { %1754 = vst [vmem:[%s3461_s13 + $0x70] sm:$0xff] %v1734_v44  ;;  %v1640_v28 = vadd.f32 %v2010_v2, %v3456_v59 }
 0x2ab   : > { %v1737_v52 = vadd.f32 %v2074_v0, %v1640_v28 }
 0x2ad   : > { %1755 = vst [vmem:[%s3461_s13 + $0x78] sm:$0xff] %v1737_v52 }
 0x2ae   : > { %2452 = shalt.err (!%p2449_p9)
}
 0x2af   : > { %s2453_s6 = scalar_lea.hbm %s3498_s11, 2048  ;;  %s2457_s10 = scalar_lea.hbm %s3549_s5, 4096 }
 0x2b0   : > { %p2454_p13 = scmp.ne.s32.totalorder %s3498_s11, %s2453_s6  ;;  %p2458_p4 = scmp.lt.s32.totalorder %s3498_s11, %s3549_s5 }
 0x2b1   : > { %p2459_p8 = scmp.lt.s32.totalorder %s2457_s10, %s2453_s6 }
 0x2b2   : > { %p2455_p5 = pnand %p2454_p13, %p3650_p10 }
 0x2b3   : > { %p2460_p7 = por %p2459_p8, %p2458_p4 }
 0x2b4   : > { %p2456_p0 = pneg %p2455_p5 }
 0x2b6   : > { %p2461_p11 = pnand %p2460_p7, %p2456_p0 }
 0x2b8   : > { %2464 = shalt.err (!%p2461_p11)
}
 0x2b9   : > { %s2520_s14 = smov 128   ;;  %s2521_s8 = smov 8  }
 0x2ba   : > { %2085 = dma.vmem_to_hbm [thread:$0]  (%p3650_p10), %s3500_s29, 2048, %s3498_s11, %s1757_s15, %s2520_s14, %s2520_s14, %s2521_s8  }
 0x2bb PF: > { %s1785_s9 = sand.u32 1, %s2495_s18   ;;  %p3651_p1 = scmp.ne.s32.totalorder %s3562_s25, 0 }
 0x2bc   : > { %p3652_p2 = scmp.ge.s32.totalorder %s2507_s21, 2  ;;  %s1786_s16 = scalar_lea.sflag [#allocation4], %s1785_s9 }
 0x2be   : > { %p2099_p6 = pnand %p3652_p2, %p3651_p1 }
 0x2c0   : > { %p2100_p12 = pneg %p2099_p6 }
 0x2c2   : > { %2490 = dma.done.wait (%p2100_p12), %s1786_s16, 2048  }
 0x2c3   : > { %2492 = vsyncadd (%p2100_p12), %s1786_s16, 4294965248  ;;  %p19_p3 = scmp.ge.s32.totalorder %s2624_s17, 4   ;;  %s3653_s18 = smov %s2499_s19 }
 0x2c4   : > { %s3654_s19 = smov %s2503_s20  ;;  %s3655_s20 = smov %s2633_s28 }
 0x2c5   : > { %s3656_s21 = smov %s2624_s17  ;;  %21 = sbr.rel (!%p19_p3) target bundleno = 6 (0x6), region = 93 }
 0x2ca   :  { %1791 = vsyncpa [#allocation3], 1 }
 0x2cb   :  { %1793 = vsyncpa [#allocation3 + $0x1], 1 }
 0x2cc   :  { %1794 = vsyncpa [#allocation6], 1 }
 0x2cd   :  { %1795 = vsyncpa [#allocation4], 1 }
 0x2ce   :  { %1797 = vsyncpa [#allocation4 + $0x1], 1 }

</bundles_post_ra>
